<compile_context>
chip_gen: v7x
topology: tpu7x:2x2x1
jax: 0.10.0
libtpu: 0.0.40
codegen_flags: <defaults>
</compile_context>

<pallas_src>
import jax
import jax.numpy as jnp
from jax.experimental import pallas as pl
from jax.experimental.pallas import tpu as pltpu


def generator_read_gru_forward(inputs, noise, kp):
    """inputs: [B, L, OH] one-hot reads; noise: [B, L, 1] uniform(0,1) channel.

    Returns softplus(FC(GRU(concat([inputs, noise], axis=2)))) with shape [B, L, OUT].
    All layout handling is inside the kernel: no wrapper-side transposes or concats.
    """
    B, L, OH = inputs.shape
    H = kp["wh"].shape[0]
    OUT = kp["wfc"].shape[1]
    H2, H3 = 2 * H, 3 * H

    def kernel(x_ref,      # [B, L, OH]  one-hot reads (native batch-first layout)
               nz_ref,     # [B, L, 1]   uniform noise channel
               wi_oh_ref,  # [OH, 3H]    input->gate weights for the one-hot features
               wi_nz_ref,  # [1, 3H]     input->gate weights for the noise channel
               wh_ref,     # [H, 3H]     fused hidden->gate weights [Whr|Whz|Whn]
               bi_ref,     # [1, 3H]     b_ih with b_hr, b_hz pre-folded in
               bhn_ref,    # [1, H]      b_hn (stays hidden-side: r * (Whn h + b_hn))
               wfc_ref,    # [H, OUT]
               bfc_ref,    # [1, OUT]
               y_ref,      # [B, L, OUT] output, native batch-first layout
               h_all_ref): # scratch [B, L, H]
        # ---- hoisted input projection: ONE batched MXU matmul for every time step ----
        # concat([x, noise]) @ Wi  ==  x @ Wi[:OH] + noise * Wi[OH:]  (no concat materialized)
        x2 = x_ref[...].reshape(B * L, OH)        # layout-preserving merge of (B, L)
        nz2 = nz_ref[...].reshape(B * L, 1)
        xg = (jnp.dot(x2, wi_oh_ref[...], preferred_element_type=jnp.float32)
              + nz2 * wi_nz_ref[...]
              + bi_ref[...])                      # [B*L, 3H]; r/z hidden biases already folded
        xg = xg.reshape(B, L, H3)

        wh = wh_ref[...]
        bhn = jnp.broadcast_to(bhn_ref[...], (B, H))   # hoisted once (no per-step broadcast)

        # ---- serial GRU recurrence: only the h-side matmul + gates on the critical path ----
        h = jnp.zeros((B, H), jnp.float32)
        for t in range(L):  # L=8: static unroll, all slices/stores static
            xg_t = xg[:, t, :]                                          # [B, 3H]
            hg = jnp.dot(h, wh, preferred_element_type=jnp.float32)     # [B, 3H], no bias add
            rz = jax.nn.sigmoid(xg_t[:, :H2] + hg[:, :H2])              # fused r|z EUP push
            r = rz[:, :H]
            z = rz[:, H:]
            n = jnp.tanh(xg_t[:, H2:] + r * (hg[:, H2:] + bhn))         # [B, H]
            h = n + z * (h - n)                    # == (1-z)*n + z*h, one fewer VALU op
            h_all_ref[:, t, :] = h                 # per-step store into VMEM scratch

        # ---- batched FC + Softplus over all (b, t), single dense store ----
        h_all = h_all_ref[...].reshape(B * L, H)
        y = (jnp.dot(h_all, wfc_ref[...], preferred_element_type=jnp.float32)
             + bfc_ref[...])                       # [B*L, OUT]
        y_ref[...] = jax.nn.softplus(y).reshape(B, L, OUT)

    vmem = pl.BlockSpec(memory_space=pltpu.MemorySpace.VMEM)   # whole array, VMEM-resident
    return pl.pallas_call(
        kernel,
        out_shape=jax.ShapeDtypeStruct((B, L, OUT), jnp.float32),
        in_specs=[vmem] * 9,
        out_specs=vmem,
        scratch_shapes=[pltpu.VMEM((B, L, H), jnp.float32)],
    )(inputs, noise, kp["wi_oh"], kp["wi_nz"], kp["wh"], kp["bi"],
      kp["bhn"], kp["wfc"], kp["bfc"])


def reference_forward(x, raw):
    """Pure-JAX reference (lax.scan GRU, PyTorch nn.GRU semantics). x: [B, L, IN]."""
    H = raw["wh"].shape[0]
    x_tm = jnp.transpose(x, (1, 0, 2))                            # [L, B, IN]

    def step(h, x_t):
        xg = x_t @ raw["wi"] + raw["bi"]
        hg = h @ raw["wh"] + raw["bh"]
        r = jax.nn.sigmoid(xg[:, :H] + hg[:, :H])
        z = jax.nn.sigmoid(xg[:, H:2 * H] + hg[:, H:2 * H])
        n = jnp.tanh(xg[:, 2 * H:] + r * hg[:, 2 * H:])
        h_new = (1.0 - z) * n + z * h
        y = jax.nn.softplus(h_new @ raw["wfc"] + raw["bfc"])
        return h_new, y

    B = x.shape[0]
    h0 = jnp.zeros((B, H), jnp.float32)
    _, ys = jax.lax.scan(step, h0, x_tm)
    return jnp.transpose(ys, (1, 0, 2))                           # [B, L, OUT]


def make_params(key, in_size, hidden, out_size):
    """Synthetic PyTorch-style GRU/FC parameters in fused 'math' orientation."""
    ks = jax.random.split(key, 14)
    s = 1.0 / jnp.sqrt(hidden)
    u = lambda k, shape: jax.random.uniform(k, shape, jnp.float32, -s, s)
    wir, wiz, win = u(ks[0], (in_size, hidden)), u(ks[1], (in_size, hidden)), u(ks[2], (in_size, hidden))
    whr, whz, whn = u(ks[3], (hidden, hidden)), u(ks[4], (hidden, hidden)), u(ks[5], (hidden, hidden))
    b_ir, b_iz, b_in = u(ks[6], (1, hidden)), u(ks[7], (1, hidden)), u(ks[8], (1, hidden))
    b_hr, b_hz, b_hn = u(ks[9], (1, hidden)), u(ks[10], (1, hidden)), u(ks[11], (1, hidden))
    return {
        "wi": jnp.concatenate([wir, wiz, win], axis=1),           # [IN, 3H]
        "wh": jnp.concatenate([whr, whz, whn], axis=1),           # [H, 3H]
        "bi": jnp.concatenate([b_ir, b_iz, b_in], axis=1),        # [1, 3H]
        "bh": jnp.concatenate([b_hr, b_hz, b_hn], axis=1),        # [1, 3H]
        "wfc": u(ks[12], (hidden, out_size)),                     # [H, OUT]
        "bfc": u(ks[13], (1, out_size)),                          # [1, OUT]
    }


def prep_kernel_params(raw, onehot_size):
    """One-time offline fold of raw GRU params into the forms the kernel consumes."""
    H = raw["wh"].shape[0]
    # Fold the r/z hidden-side biases into the input-side bias (exact for PyTorch GRU).
    bi_eff = raw["bi"].at[:, :2 * H].add(raw["bh"][:, :2 * H])
    return {
        "wi_oh": raw["wi"][:onehot_size, :],   # [OH, 3H] one-hot feature rows of Wi
        "wi_nz": raw["wi"][onehot_size:, :],   # [1, 3H]  noise-channel row of Wi
        "wh": raw["wh"],                       # [H, 3H]
        "bi": bi_eff,                          # [1, 3H]
        "bhn": raw["bh"][:, 2 * H:],           # [1, H]   MUST stay hidden-side (inside r*(...))
        "wfc": raw["wfc"],                     # [H, OUT]
        "bfc": raw["bfc"],                     # [1, OUT]
    }


if __name__ == "__main__":
    B, L = 2, 8            # batch size, read length
    ONEHOT = 8             # A, C, G, T, -, S, E, P
    IN = ONEHOT + 1        # one-hot + appended uniform noise channel
    H = 32                 # G_hidden_size
    OUT = ONEHOT           # output_size = len(INV_BASE_MAP) = 8

    key = jax.random.PRNGKey(0)
    k_in, k_noise, k_params = jax.random.split(key, 3)

    # One-hot reads [B, L, 8]
    idx = jax.random.randint(k_in, (B, L), 0, ONEHOT)
    inputs = jax.nn.one_hot(idx, ONEHOT, dtype=jnp.float32)

    # Uniform(0,1) noise column (sampled here so the kernel run is deterministic/verifiable)
    noise = jax.random.uniform(k_noise, (B, L, 1), jnp.float32, 0.0, 1.0)

    raw = make_params(k_params, IN, H, OUT)
    kparams = prep_kernel_params(raw, ONEHOT)

    y = generator_read_gru_forward(inputs, noise, kparams)       # [B, L, 8]
    jax.block_until_ready(y)

    # Sanity check against a pure-JAX reference GRU on the explicitly concatenated input.
    y_ref = reference_forward(jnp.concatenate([inputs, noise], axis=2), raw)
    assert y.shape == (B, L, OUT)
    assert jnp.allclose(y, y_ref, rtol=1e-3, atol=1e-3), "mismatch vs reference GRU"

    print("KERNEL_OK")
</pallas_src>

<mosaic_0001>
module attributes {stable_mosaic.version = 11 : i64} {
  func.func @kernel(%arg0: memref<2x8x8xf32, #tpu.memory_space<vmem>>, %arg1: memref<2x8x1xf32, #tpu.memory_space<vmem>>, %arg2: memref<8x96xf32, #tpu.memory_space<vmem>>, %arg3: memref<1x96xf32, #tpu.memory_space<vmem>>, %arg4: memref<32x96xf32, #tpu.memory_space<vmem>>, %arg5: memref<1x96xf32, #tpu.memory_space<vmem>>, %arg6: memref<1x32xf32, #tpu.memory_space<vmem>>, %arg7: memref<32x8xf32, #tpu.memory_space<vmem>>, %arg8: memref<1x8xf32, #tpu.memory_space<vmem>>, %arg9: memref<2x8x8xf32, #tpu.memory_space<vmem>>, %arg10: memref<2x8x32xf32, #tpu.memory_space<vmem>>) attributes {dimension_semantics = [], scalar_prefetch = 0 : i64, scratch_operands = 1 : i64, tpu.core_type = #tpu.core_type<tc>} {
    %c0 = arith.constant 0 : index
    %c0_0 = arith.constant 0 : index
    %c0_1 = arith.constant 0 : index
    %0 = vector.load %arg0[%c0, %c0_0, %c0_1] : memref<2x8x8xf32, #tpu.memory_space<vmem>>, vector<2x8x8xf32>
    %1 = vector.shape_cast %0 : vector<2x8x8xf32> to vector<16x8xf32>
    %c0_2 = arith.constant 0 : index
    %c0_3 = arith.constant 0 : index
    %c0_4 = arith.constant 0 : index
    %2 = vector.load %arg1[%c0_2, %c0_3, %c0_4] : memref<2x8x1xf32, #tpu.memory_space<vmem>>, vector<2x8x1xf32>
    %3 = vector.shape_cast %2 : vector<2x8x1xf32> to vector<16x1xf32>
    %c0_5 = arith.constant 0 : index
    %c0_6 = arith.constant 0 : index
    %4 = vector.load %arg2[%c0_5, %c0_6] : memref<8x96xf32, #tpu.memory_space<vmem>>, vector<8x96xf32>
    %cst = arith.constant dense<0.000000e+00> : vector<16x96xf32>
    %5 = tpu.matmul %1, %4, %cst {dimension_numbers = #tpu.dot_dimension_numbers<[1], [0], [0], [1], [0, 0, 1, 1], [], []>} : vector<16x8xf32>, vector<8x96xf32>, vector<16x96xf32> -> vector<16x96xf32>
    %c0_7 = arith.constant 0 : index
    %c0_8 = arith.constant 0 : index
    %6 = vector.load %arg3[%c0_7, %c0_8] : memref<1x96xf32, #tpu.memory_space<vmem>>, vector<1x96xf32>
    %7 = vector.broadcast %3 : vector<16x1xf32> to vector<16x96xf32>
    %8 = vector.broadcast %6 : vector<1x96xf32> to vector<16x96xf32>
    %9 = arith.mulf %7, %8 : vector<16x96xf32>
    %10 = arith.addf %5, %9 : vector<16x96xf32>
    %c0_9 = arith.constant 0 : index
    %c0_10 = arith.constant 0 : index
    %11 = vector.load %arg5[%c0_9, %c0_10] : memref<1x96xf32, #tpu.memory_space<vmem>>, vector<1x96xf32>
    %12 = vector.broadcast %11 : vector<1x96xf32> to vector<16x96xf32>
    %13 = arith.addf %10, %12 : vector<16x96xf32>
    %14 = vector.shape_cast %13 : vector<16x96xf32> to vector<2x8x96xf32>
    %c0_11 = arith.constant 0 : index
    %c0_12 = arith.constant 0 : index
    %15 = vector.load %arg4[%c0_11, %c0_12] : memref<32x96xf32, #tpu.memory_space<vmem>>, vector<32x96xf32>
    %c0_13 = arith.constant 0 : index
    %c0_14 = arith.constant 0 : index
    %16 = vector.load %arg6[%c0_13, %c0_14] : memref<1x32xf32, #tpu.memory_space<vmem>>, vector<1x32xf32>
    %17 = vector.shape_cast %16 : vector<1x32xf32> to vector<1x32xf32>
    %18 = vector.broadcast %17 : vector<1x32xf32> to vector<2x32xf32>
    %cst_15 = arith.constant 0.000000e+00 : f32
    %19 = vector.broadcast %cst_15 : f32 to vector<2x32xf32>
    %20 = vector.extract_strided_slice %14 {offsets = [0, 0, 0], sizes = [2, 1, 96], strides = [1, 1, 1]} : vector<2x8x96xf32> to vector<2x1x96xf32>
    %21 = vector.shape_cast %20 : vector<2x1x96xf32> to vector<2x96xf32>
    %cst_16 = arith.constant dense<0.000000e+00> : vector<2x96xf32>
    %22 = tpu.matmul %19, %15, %cst_16 {dimension_numbers = #tpu.dot_dimension_numbers<[1], [0], [0], [1], [0, 0, 1, 1], [], []>} : vector<2x32xf32>, vector<32x96xf32>, vector<2x96xf32> -> vector<2x96xf32>
    %23 = vector.extract_strided_slice %21 {offsets = [0, 0], sizes = [2, 64], strides = [1, 1]} : vector<2x96xf32> to vector<2x64xf32>
    %24 = vector.extract_strided_slice %22 {offsets = [0, 0], sizes = [2, 64], strides = [1, 1]} : vector<2x96xf32> to vector<2x64xf32>
    %25 = arith.addf %23, %24 : vector<2x64xf32>
    %26 = arith.negf %25 : vector<2x64xf32>
    %27 = math.exp %26 : vector<2x64xf32>
    %cst_17 = arith.constant 1.000000e+00 : f32
    %28 = vector.broadcast %cst_17 : f32 to vector<2x64xf32>
    %29 = arith.addf %28, %27 : vector<2x64xf32>
    %30 = arith.divf %28, %29 : vector<2x64xf32>
    %31 = vector.extract_strided_slice %30 {offsets = [0, 0], sizes = [2, 32], strides = [1, 1]} : vector<2x64xf32> to vector<2x32xf32>
    %32 = vector.extract_strided_slice %30 {offsets = [0, 32], sizes = [2, 32], strides = [1, 1]} : vector<2x64xf32> to vector<2x32xf32>
    %33 = vector.extract_strided_slice %21 {offsets = [0, 64], sizes = [2, 32], strides = [1, 1]} : vector<2x96xf32> to vector<2x32xf32>
    %34 = vector.extract_strided_slice %22 {offsets = [0, 64], sizes = [2, 32], strides = [1, 1]} : vector<2x96xf32> to vector<2x32xf32>
    %35 = arith.addf %34, %18 : vector<2x32xf32>
    %36 = arith.mulf %31, %35 : vector<2x32xf32>
    %37 = arith.addf %33, %36 : vector<2x32xf32>
    %38 = math.tanh %37 : vector<2x32xf32>
    %39 = arith.subf %19, %38 : vector<2x32xf32>
    %40 = arith.mulf %32, %39 : vector<2x32xf32>
    %41 = arith.addf %38, %40 : vector<2x32xf32>
    %c0_18 = arith.constant 0 : index
    %c0_19 = arith.constant 0 : index
    %c0_20 = arith.constant 0 : index
    %42 = vector.load %arg10[%c0_18, %c0_19, %c0_20] : memref<2x8x32xf32, #tpu.memory_space<vmem>>, vector<2x1x32xf32>
    %43 = vector.shape_cast %42 : vector<2x1x32xf32> to vector<2x32xf32>
    %44 = vector.shape_cast %41 : vector<2x32xf32> to vector<2x1x32xf32>
    tpu.vector_store %arg10[%c0_18, %c0_19, %c0_20], %44 {strides = array<i32>} : memref<2x8x32xf32, #tpu.memory_space<vmem>>, vector<2x1x32xf32>,
    %45 = vector.extract_strided_slice %14 {offsets = [0, 1, 0], sizes = [2, 1, 96], strides = [1, 1, 1]} : vector<2x8x96xf32> to vector<2x1x96xf32>
    %46 = vector.shape_cast %45 : vector<2x1x96xf32> to vector<2x96xf32>
    %cst_21 = arith.constant dense<0.000000e+00> : vector<2x96xf32>
    %47 = tpu.matmul %41, %15, %cst_21 {dimension_numbers = #tpu.dot_dimension_numbers<[1], [0], [0], [1], [0, 0, 1, 1], [], []>} : vector<2x32xf32>, vector<32x96xf32>, vector<2x96xf32> -> vector<2x96xf32>
    %48 = vector.extract_strided_slice %46 {offsets = [0, 0], sizes = [2, 64], strides = [1, 1]} : vector<2x96xf32> to vector<2x64xf32>
    %49 = vector.extract_strided_slice %47 {offsets = [0, 0], sizes = [2, 64], strides = [1, 1]} : vector<2x96xf32> to vector<2x64xf32>
    %50 = arith.addf %48, %49 : vector<2x64xf32>
    %51 = arith.negf %50 : vector<2x64xf32>
    %52 = math.exp %51 : vector<2x64xf32>
    %cst_22 = arith.constant 1.000000e+00 : f32
    %53 = vector.broadcast %cst_22 : f32 to vector<2x64xf32>
    %54 = arith.addf %53, %52 : vector<2x64xf32>
    %55 = arith.divf %53, %54 : vector<2x64xf32>
    %56 = vector.extract_strided_slice %55 {offsets = [0, 0], sizes = [2, 32], strides = [1, 1]} : vector<2x64xf32> to vector<2x32xf32>
    %57 = vector.extract_strided_slice %55 {offsets = [0, 32], sizes = [2, 32], strides = [1, 1]} : vector<2x64xf32> to vector<2x32xf32>
    %58 = vector.extract_strided_slice %46 {offsets = [0, 64], sizes = [2, 32], strides = [1, 1]} : vector<2x96xf32> to vector<2x32xf32>
    %59 = vector.extract_strided_slice %47 {offsets = [0, 64], sizes = [2, 32], strides = [1, 1]} : vector<2x96xf32> to vector<2x32xf32>
    %60 = arith.addf %59, %18 : vector<2x32xf32>
    %61 = arith.mulf %56, %60 : vector<2x32xf32>
    %62 = arith.addf %58, %61 : vector<2x32xf32>
    %63 = math.tanh %62 : vector<2x32xf32>
    %64 = arith.subf %41, %63 : vector<2x32xf32>
    %65 = arith.mulf %57, %64 : vector<2x32xf32>
    %66 = arith.addf %63, %65 : vector<2x32xf32>
    %c0_23 = arith.constant 0 : index
    %c1 = arith.constant 1 : index
    %c0_24 = arith.constant 0 : index
    %67 = vector.load %arg10[%c0_23, %c1, %c0_24] : memref<2x8x32xf32, #tpu.memory_space<vmem>>, vector<2x1x32xf32>
    %68 = vector.shape_cast %67 : vector<2x1x32xf32> to vector<2x32xf32>
    %69 = vector.shape_cast %66 : vector<2x32xf32> to vector<2x1x32xf32>
    tpu.vector_store %arg10[%c0_23, %c1, %c0_24], %69 {strides = array<i32>} : memref<2x8x32xf32, #tpu.memory_space<vmem>>, vector<2x1x32xf32>,
    %70 = vector.extract_strided_slice %14 {offsets = [0, 2, 0], sizes = [2, 1, 96], strides = [1, 1, 1]} : vector<2x8x96xf32> to vector<2x1x96xf32>
    %71 = vector.shape_cast %70 : vector<2x1x96xf32> to vector<2x96xf32>
    %cst_25 = arith.constant dense<0.000000e+00> : vector<2x96xf32>
    %72 = tpu.matmul %66, %15, %cst_25 {dimension_numbers = #tpu.dot_dimension_numbers<[1], [0], [0], [1], [0, 0, 1, 1], [], []>} : vector<2x32xf32>, vector<32x96xf32>, vector<2x96xf32> -> vector<2x96xf32>
    %73 = vector.extract_strided_slice %71 {offsets = [0, 0], sizes = [2, 64], strides = [1, 1]} : vector<2x96xf32> to vector<2x64xf32>
    %74 = vector.extract_strided_slice %72 {offsets = [0, 0], sizes = [2, 64], strides = [1, 1]} : vector<2x96xf32> to vector<2x64xf32>
    %75 = arith.addf %73, %74 : vector<2x64xf32>
    %76 = arith.negf %75 : vector<2x64xf32>
    %77 = math.exp %76 : vector<2x64xf32>
    %cst_26 = arith.constant 1.000000e+00 : f32
    %78 = vector.broadcast %cst_26 : f32 to vector<2x64xf32>
    %79 = arith.addf %78, %77 : vector<2x64xf32>
    %80 = arith.divf %78, %79 : vector<2x64xf32>
    %81 = vector.extract_strided_slice %80 {offsets = [0, 0], sizes = [2, 32], strides = [1, 1]} : vector<2x64xf32> to vector<2x32xf32>
    %82 = vector.extract_strided_slice %80 {offsets = [0, 32], sizes = [2, 32], strides = [1, 1]} : vector<2x64xf32> to vector<2x32xf32>
    %83 = vector.extract_strided_slice %71 {offsets = [0, 64], sizes = [2, 32], strides = [1, 1]} : vector<2x96xf32> to vector<2x32xf32>
    %84 = vector.extract_strided_slice %72 {offsets = [0, 64], sizes = [2, 32], strides = [1, 1]} : vector<2x96xf32> to vector<2x32xf32>
    %85 = arith.addf %84, %18 : vector<2x32xf32>
    %86 = arith.mulf %81, %85 : vector<2x32xf32>
    %87 = arith.addf %83, %86 : vector<2x32xf32>
    %88 = math.tanh %87 : vector<2x32xf32>
    %89 = arith.subf %66, %88 : vector<2x32xf32>
    %90 = arith.mulf %82, %89 : vector<2x32xf32>
    %91 = arith.addf %88, %90 : vector<2x32xf32>
    %c0_27 = arith.constant 0 : index
    %c2 = arith.constant 2 : index
    %c0_28 = arith.constant 0 : index
    %92 = vector.load %arg10[%c0_27, %c2, %c0_28] : memref<2x8x32xf32, #tpu.memory_space<vmem>>, vector<2x1x32xf32>
    %93 = vector.shape_cast %92 : vector<2x1x32xf32> to vector<2x32xf32>
    %94 = vector.shape_cast %91 : vector<2x32xf32> to vector<2x1x32xf32>
    tpu.vector_store %arg10[%c0_27, %c2, %c0_28], %94 {strides = array<i32>} : memref<2x8x32xf32, #tpu.memory_space<vmem>>, vector<2x1x32xf32>,
    %95 = vector.extract_strided_slice %14 {offsets = [0, 3, 0], sizes = [2, 1, 96], strides = [1, 1, 1]} : vector<2x8x96xf32> to vector<2x1x96xf32>
    %96 = vector.shape_cast %95 : vector<2x1x96xf32> to vector<2x96xf32>
    %cst_29 = arith.constant dense<0.000000e+00> : vector<2x96xf32>
    %97 = tpu.matmul %91, %15, %cst_29 {dimension_numbers = #tpu.dot_dimension_numbers<[1], [0], [0], [1], [0, 0, 1, 1], [], []>} : vector<2x32xf32>, vector<32x96xf32>, vector<2x96xf32> -> vector<2x96xf32>
    %98 = vector.extract_strided_slice %96 {offsets = [0, 0], sizes = [2, 64], strides = [1, 1]} : vector<2x96xf32> to vector<2x64xf32>
    %99 = vector.extract_strided_slice %97 {offsets = [0, 0], sizes = [2, 64], strides = [1, 1]} : vector<2x96xf32> to vector<2x64xf32>
    %100 = arith.addf %98, %99 : vector<2x64xf32>
    %101 = arith.negf %100 : vector<2x64xf32>
    %102 = math.exp %101 : vector<2x64xf32>
    %cst_30 = arith.constant 1.000000e+00 : f32
    %103 = vector.broadcast %cst_30 : f32 to vector<2x64xf32>
    %104 = arith.addf %103, %102 : vector<2x64xf32>
    %105 = arith.divf %103, %104 : vector<2x64xf32>
    %106 = vector.extract_strided_slice %105 {offsets = [0, 0], sizes = [2, 32], strides = [1, 1]} : vector<2x64xf32> to vector<2x32xf32>
    %107 = vector.extract_strided_slice %105 {offsets = [0, 32], sizes = [2, 32], strides = [1, 1]} : vector<2x64xf32> to vector<2x32xf32>
    %108 = vector.extract_strided_slice %96 {offsets = [0, 64], sizes = [2, 32], strides = [1, 1]} : vector<2x96xf32> to vector<2x32xf32>
    %109 = vector.extract_strided_slice %97 {offsets = [0, 64], sizes = [2, 32], strides = [1, 1]} : vector<2x96xf32> to vector<2x32xf32>
    %110 = arith.addf %109, %18 : vector<2x32xf32>
    %111 = arith.mulf %106, %110 : vector<2x32xf32>
    %112 = arith.addf %108, %111 : vector<2x32xf32>
    %113 = math.tanh %112 : vector<2x32xf32>
    %114 = arith.subf %91, %113 : vector<2x32xf32>
    %115 = arith.mulf %107, %114 : vector<2x32xf32>
    %116 = arith.addf %113, %115 : vector<2x32xf32>
    %c0_31 = arith.constant 0 : index
    %c3 = arith.constant 3 : index
    %c0_32 = arith.constant 0 : index
    %117 = vector.load %arg10[%c0_31, %c3, %c0_32] : memref<2x8x32xf32, #tpu.memory_space<vmem>>, vector<2x1x32xf32>
    %118 = vector.shape_cast %117 : vector<2x1x32xf32> to vector<2x32xf32>
    %119 = vector.shape_cast %116 : vector<2x32xf32> to vector<2x1x32xf32>
    tpu.vector_store %arg10[%c0_31, %c3, %c0_32], %119 {strides = array<i32>} : memref<2x8x32xf32, #tpu.memory_space<vmem>>, vector<2x1x32xf32>,
    %120 = vector.extract_strided_slice %14 {offsets = [0, 4, 0], sizes = [2, 1, 96], strides = [1, 1, 1]} : vector<2x8x96xf32> to vector<2x1x96xf32>
    %121 = vector.shape_cast %120 : vector<2x1x96xf32> to vector<2x96xf32>
    %cst_33 = arith.constant dense<0.000000e+00> : vector<2x96xf32>
    %122 = tpu.matmul %116, %15, %cst_33 {dimension_numbers = #tpu.dot_dimension_numbers<[1], [0], [0], [1], [0, 0, 1, 1], [], []>} : vector<2x32xf32>, vector<32x96xf32>, vector<2x96xf32> -> vector<2x96xf32>
    %123 = vector.extract_strided_slice %121 {offsets = [0, 0], sizes = [2, 64], strides = [1, 1]} : vector<2x96xf32> to vector<2x64xf32>
    %124 = vector.extract_strided_slice %122 {offsets = [0, 0], sizes = [2, 64], strides = [1, 1]} : vector<2x96xf32> to vector<2x64xf32>
    %125 = arith.addf %123, %124 : vector<2x64xf32>
    %126 = arith.negf %125 : vector<2x64xf32>
    %127 = math.exp %126 : vector<2x64xf32>
    %cst_34 = arith.constant 1.000000e+00 : f32
    %128 = vector.broadcast %cst_34 : f32 to vector<2x64xf32>
    %129 = arith.addf %128, %127 : vector<2x64xf32>
    %130 = arith.divf %128, %129 : vector<2x64xf32>
    %131 = vector.extract_strided_slice %130 {offsets = [0, 0], sizes = [2, 32], strides = [1, 1]} : vector<2x64xf32> to vector<2x32xf32>
    %132 = vector.extract_strided_slice %130 {offsets = [0, 32], sizes = [2, 32], strides = [1, 1]} : vector<2x64xf32> to vector<2x32xf32>
    %133 = vector.extract_strided_slice %121 {offsets = [0, 64], sizes = [2, 32], strides = [1, 1]} : vector<2x96xf32> to vector<2x32xf32>
    %134 = vector.extract_strided_slice %122 {offsets = [0, 64], sizes = [2, 32], strides = [1, 1]} : vector<2x96xf32> to vector<2x32xf32>
    %135 = arith.addf %134, %18 : vector<2x32xf32>
    %136 = arith.mulf %131, %135 : vector<2x32xf32>
    %137 = arith.addf %133, %136 : vector<2x32xf32>
    %138 = math.tanh %137 : vector<2x32xf32>
    %139 = arith.subf %116, %138 : vector<2x32xf32>
    %140 = arith.mulf %132, %139 : vector<2x32xf32>
    %141 = arith.addf %138, %140 : vector<2x32xf32>
    %c0_35 = arith.constant 0 : index
    %c4 = arith.constant 4 : index
    %c0_36 = arith.constant 0 : index
    %142 = vector.load %arg10[%c0_35, %c4, %c0_36] : memref<2x8x32xf32, #tpu.memory_space<vmem>>, vector<2x1x32xf32>
    %143 = vector.shape_cast %142 : vector<2x1x32xf32> to vector<2x32xf32>
    %144 = vector.shape_cast %141 : vector<2x32xf32> to vector<2x1x32xf32>
    tpu.vector_store %arg10[%c0_35, %c4, %c0_36], %144 {strides = array<i32>} : memref<2x8x32xf32, #tpu.memory_space<vmem>>, vector<2x1x32xf32>,
    %145 = vector.extract_strided_slice %14 {offsets = [0, 5, 0], sizes = [2, 1, 96], strides = [1, 1, 1]} : vector<2x8x96xf32> to vector<2x1x96xf32>
    %146 = vector.shape_cast %145 : vector<2x1x96xf32> to vector<2x96xf32>
    %cst_37 = arith.constant dense<0.000000e+00> : vector<2x96xf32>
    %147 = tpu.matmul %141, %15, %cst_37 {dimension_numbers = #tpu.dot_dimension_numbers<[1], [0], [0], [1], [0, 0, 1, 1], [], []>} : vector<2x32xf32>, vector<32x96xf32>, vector<2x96xf32> -> vector<2x96xf32>
    %148 = vector.extract_strided_slice %146 {offsets = [0, 0], sizes = [2, 64], strides = [1, 1]} : vector<2x96xf32> to vector<2x64xf32>
    %149 = vector.extract_strided_slice %147 {offsets = [0, 0], sizes = [2, 64], strides = [1, 1]} : vector<2x96xf32> to vector<2x64xf32>
    %150 = arith.addf %148, %149 : vector<2x64xf32>
    %151 = arith.negf %150 : vector<2x64xf32>
    %152 = math.exp %151 : vector<2x64xf32>
    %cst_38 = arith.constant 1.000000e+00 : f32
    %153 = vector.broadcast %cst_38 : f32 to vector<2x64xf32>
    %154 = arith.addf %153, %152 : vector<2x64xf32>
    %155 = arith.divf %153, %154 : vector<2x64xf32>
    %156 = vector.extract_strided_slice %155 {offsets = [0, 0], sizes = [2, 32], strides = [1, 1]} : vector<2x64xf32> to vector<2x32xf32>
    %157 = vector.extract_strided_slice %155 {offsets = [0, 32], sizes = [2, 32], strides = [1, 1]} : vector<2x64xf32> to vector<2x32xf32>
    %158 = vector.extract_strided_slice %146 {offsets = [0, 64], sizes = [2, 32], strides = [1, 1]} : vector<2x96xf32> to vector<2x32xf32>
    %159 = vector.extract_strided_slice %147 {offsets = [0, 64], sizes = [2, 32], strides = [1, 1]} : vector<2x96xf32> to vector<2x32xf32>
    %160 = arith.addf %159, %18 : vector<2x32xf32>
    %161 = arith.mulf %156, %160 : vector<2x32xf32>
    %162 = arith.addf %158, %161 : vector<2x32xf32>
    %163 = math.tanh %162 : vector<2x32xf32>
    %164 = arith.subf %141, %163 : vector<2x32xf32>
    %165 = arith.mulf %157, %164 : vector<2x32xf32>
    %166 = arith.addf %163, %165 : vector<2x32xf32>
    %c0_39 = arith.constant 0 : index
    %c5 = arith.constant 5 : index
    %c0_40 = arith.constant 0 : index
    %167 = vector.load %arg10[%c0_39, %c5, %c0_40] : memref<2x8x32xf32, #tpu.memory_space<vmem>>, vector<2x1x32xf32>
    %168 = vector.shape_cast %167 : vector<2x1x32xf32> to vector<2x32xf32>
    %169 = vector.shape_cast %166 : vector<2x32xf32> to vector<2x1x32xf32>
    tpu.vector_store %arg10[%c0_39, %c5, %c0_40], %169 {strides = array<i32>} : memref<2x8x32xf32, #tpu.memory_space<vmem>>, vector<2x1x32xf32>,
    %170 = vector.extract_strided_slice %14 {offsets = [0, 6, 0], sizes = [2, 1, 96], strides = [1, 1, 1]} : vector<2x8x96xf32> to vector<2x1x96xf32>
    %171 = vector.shape_cast %170 : vector<2x1x96xf32> to vector<2x96xf32>
    %cst_41 = arith.constant dense<0.000000e+00> : vector<2x96xf32>
    %172 = tpu.matmul %166, %15, %cst_41 {dimension_numbers = #tpu.dot_dimension_numbers<[1], [0], [0], [1], [0, 0, 1, 1], [], []>} : vector<2x32xf32>, vector<32x96xf32>, vector<2x96xf32> -> vector<2x96xf32>
    %173 = vector.extract_strided_slice %171 {offsets = [0, 0], sizes = [2, 64], strides = [1, 1]} : vector<2x96xf32> to vector<2x64xf32>
    %174 = vector.extract_strided_slice %172 {offsets = [0, 0], sizes = [2, 64], strides = [1, 1]} : vector<2x96xf32> to vector<2x64xf32>
    %175 = arith.addf %173, %174 : vector<2x64xf32>
    %176 = arith.negf %175 : vector<2x64xf32>
    %177 = math.exp %176 : vector<2x64xf32>
    %cst_42 = arith.constant 1.000000e+00 : f32
    %178 = vector.broadcast %cst_42 : f32 to vector<2x64xf32>
    %179 = arith.addf %178, %177 : vector<2x64xf32>
    %180 = arith.divf %178, %179 : vector<2x64xf32>
    %181 = vector.extract_strided_slice %180 {offsets = [0, 0], sizes = [2, 32], strides = [1, 1]} : vector<2x64xf32> to vector<2x32xf32>
    %182 = vector.extract_strided_slice %180 {offsets = [0, 32], sizes = [2, 32], strides = [1, 1]} : vector<2x64xf32> to vector<2x32xf32>
    %183 = vector.extract_strided_slice %171 {offsets = [0, 64], sizes = [2, 32], strides = [1, 1]} : vector<2x96xf32> to vector<2x32xf32>
    %184 = vector.extract_strided_slice %172 {offsets = [0, 64], sizes = [2, 32], strides = [1, 1]} : vector<2x96xf32> to vector<2x32xf32>
    %185 = arith.addf %184, %18 : vector<2x32xf32>
    %186 = arith.mulf %181, %185 : vector<2x32xf32>
    %187 = arith.addf %183, %186 : vector<2x32xf32>
    %188 = math.tanh %187 : vector<2x32xf32>
    %189 = arith.subf %166, %188 : vector<2x32xf32>
    %190 = arith.mulf %182, %189 : vector<2x32xf32>
    %191 = arith.addf %188, %190 : vector<2x32xf32>
    %c0_43 = arith.constant 0 : index
    %c6 = arith.constant 6 : index
    %c0_44 = arith.constant 0 : index
    %192 = vector.load %arg10[%c0_43, %c6, %c0_44] : memref<2x8x32xf32, #tpu.memory_space<vmem>>, vector<2x1x32xf32>
    %193 = vector.shape_cast %192 : vector<2x1x32xf32> to vector<2x32xf32>
    %194 = vector.shape_cast %191 : vector<2x32xf32> to vector<2x1x32xf32>
    tpu.vector_store %arg10[%c0_43, %c6, %c0_44], %194 {strides = array<i32>} : memref<2x8x32xf32, #tpu.memory_space<vmem>>, vector<2x1x32xf32>,
    %195 = vector.extract_strided_slice %14 {offsets = [0, 7, 0], sizes = [2, 1, 96], strides = [1, 1, 1]} : vector<2x8x96xf32> to vector<2x1x96xf32>
    %196 = vector.shape_cast %195 : vector<2x1x96xf32> to vector<2x96xf32>
    %cst_45 = arith.constant dense<0.000000e+00> : vector<2x96xf32>
    %197 = tpu.matmul %191, %15, %cst_45 {dimension_numbers = #tpu.dot_dimension_numbers<[1], [0], [0], [1], [0, 0, 1, 1], [], []>} : vector<2x32xf32>, vector<32x96xf32>, vector<2x96xf32> -> vector<2x96xf32>
    %198 = vector.extract_strided_slice %196 {offsets = [0, 0], sizes = [2, 64], strides = [1, 1]} : vector<2x96xf32> to vector<2x64xf32>
    %199 = vector.extract_strided_slice %197 {offsets = [0, 0], sizes = [2, 64], strides = [1, 1]} : vector<2x96xf32> to vector<2x64xf32>
    %200 = arith.addf %198, %199 : vector<2x64xf32>
    %201 = arith.negf %200 : vector<2x64xf32>
    %202 = math.exp %201 : vector<2x64xf32>
    %cst_46 = arith.constant 1.000000e+00 : f32
    %203 = vector.broadcast %cst_46 : f32 to vector<2x64xf32>
    %204 = arith.addf %203, %202 : vector<2x64xf32>
    %205 = arith.divf %203, %204 : vector<2x64xf32>
    %206 = vector.extract_strided_slice %205 {offsets = [0, 0], sizes = [2, 32], strides = [1, 1]} : vector<2x64xf32> to vector<2x32xf32>
    %207 = vector.extract_strided_slice %205 {offsets = [0, 32], sizes = [2, 32], strides = [1, 1]} : vector<2x64xf32> to vector<2x32xf32>
    %208 = vector.extract_strided_slice %196 {offsets = [0, 64], sizes = [2, 32], strides = [1, 1]} : vector<2x96xf32> to vector<2x32xf32>
    %209 = vector.extract_strided_slice %197 {offsets = [0, 64], sizes = [2, 32], strides = [1, 1]} : vector<2x96xf32> to vector<2x32xf32>
    %210 = arith.addf %209, %18 : vector<2x32xf32>
    %211 = arith.mulf %206, %210 : vector<2x32xf32>
    %212 = arith.addf %208, %211 : vector<2x32xf32>
    %213 = math.tanh %212 : vector<2x32xf32>
    %214 = arith.subf %191, %213 : vector<2x32xf32>
    %215 = arith.mulf %207, %214 : vector<2x32xf32>
    %216 = arith.addf %213, %215 : vector<2x32xf32>
    %c0_47 = arith.constant 0 : index
    %c7 = arith.constant 7 : index
    %c0_48 = arith.constant 0 : index
    %217 = vector.load %arg10[%c0_47, %c7, %c0_48] : memref<2x8x32xf32, #tpu.memory_space<vmem>>, vector<2x1x32xf32>
    %218 = vector.shape_cast %217 : vector<2x1x32xf32> to vector<2x32xf32>
    %219 = vector.shape_cast %216 : vector<2x32xf32> to vector<2x1x32xf32>
    tpu.vector_store %arg10[%c0_47, %c7, %c0_48], %219 {strides = array<i32>} : memref<2x8x32xf32, #tpu.memory_space<vmem>>, vector<2x1x32xf32>,
    %c0_49 = arith.constant 0 : index
    %c0_50 = arith.constant 0 : index
    %c0_51 = arith.constant 0 : index
    %220 = vector.load %arg10[%c0_49, %c0_50, %c0_51] : memref<2x8x32xf32, #tpu.memory_space<vmem>>, vector<2x8x32xf32>
    %221 = vector.shape_cast %220 : vector<2x8x32xf32> to vector<16x32xf32>
    %c0_52 = arith.constant 0 : index
    %c0_53 = arith.constant 0 : index
    %222 = vector.load %arg7[%c0_52, %c0_53] : memref<32x8xf32, #tpu.memory_space<vmem>>, vector<32x8xf32>
    %cst_54 = arith.constant dense<0.000000e+00> : vector<16x8xf32>
    %223 = tpu.matmul %221, %222, %cst_54 {dimension_numbers = #tpu.dot_dimension_numbers<[1], [0], [0], [1], [0, 0, 1, 1], [], []>} : vector<16x32xf32>, vector<32x8xf32>, vector<16x8xf32> -> vector<16x8xf32>
    %c0_55 = arith.constant 0 : index
    %c0_56 = arith.constant 0 : index
    %224 = vector.load %arg8[%c0_55, %c0_56] : memref<1x8xf32, #tpu.memory_space<vmem>>, vector<1x8xf32>
    %225 = vector.broadcast %224 : vector<1x8xf32> to vector<16x8xf32>
    %226 = arith.addf %223, %225 : vector<16x8xf32>
    %cst_57 = arith.constant 0.000000e+00 : f32
    %227 = vector.broadcast %cst_57 : f32 to vector<16x8xf32>
    %228 = arith.maximumf %226, %227 : vector<16x8xf32>
    %229 = vector.broadcast %cst_57 : f32 to vector<16x8xf32>
    %230 = arith.subf %226, %229 : vector<16x8xf32>
    %231 = arith.cmpf one, %230, %230 : vector<16x8xf32>
    %232 = vector.broadcast %cst_57 : f32 to vector<16x8xf32>
    %233 = arith.addf %226, %232 : vector<16x8xf32>
    %234 = math.absf %230 : vector<16x8xf32>
    %cst_58 = arith.constant 0.000000e+00 : f32
    %235 = vector.broadcast %cst_58 : f32 to vector<16x8xf32>
    %236 = arith.subf %235, %234 : vector<16x8xf32>
    %237 = math.exp %236 : vector<16x8xf32>
    %238 = math.log1p %237 : vector<16x8xf32>
    %239 = arith.addf %228, %238 : vector<16x8xf32>
    %240 = arith.select %231, %233, %239 : vector<16x8xi1>, vector<16x8xf32>
    %241 = vector.shape_cast %240 : vector<16x8xf32> to vector<2x8x8xf32>
    %c0_59 = arith.constant 0 : index
    %c0_60 = arith.constant 0 : index
    %c0_61 = arith.constant 0 : index
    %242 = vector.load %arg9[%c0_59, %c0_60, %c0_61] : memref<2x8x8xf32, #tpu.memory_space<vmem>>, vector<2x8x8xf32>
    tpu.vector_store %arg9[%c0_59, %c0_60, %c0_61], %241 {strides = array<i32>} : memref<2x8x8xf32, #tpu.memory_space<vmem>>, vector<2x8x8xf32>,
    return
  }
}

</mosaic_0001>

<bundles_post_ra>
// kernel: tpu_custom_call.1
= control target key start
LH: loop header
LB: loop body
LE: loop exit
PB: predicated region body
PF: predicated region fallthrough
CT: control target
= control target key end

     0   :  { %vm57_vm0 = vcmask 64512   ;;  %v1961_v3 = vmov 0.0|0.0   ;;  %s2375_s0 = inlined_call_operand.vmem [shape: f32[2,8,8], index: 0, kind: input, shape index: {}]   ;;  %s2376_s1 = inlined_call_operand.vmem [shape: f32[2,8,1], index: 1, kind: input, shape index: {}]   ;;  %s2377_s2 = inlined_call_operand.vmem [shape: f32[8,96], index: 2, kind: input, shape index: {}]   ;;  %s2378_s3 = inlined_call_operand.vmem [shape: f32[1,96], index: 3, kind: input, shape index: {}]   ;;  %s2379_s4 = inlined_call_operand.vmem [shape: f32[32,96], index: 4, kind: input, shape index: {}]   ;;  %s2380_s5 = inlined_call_operand.vmem [shape: f32[1,96], index: 5, kind: input, shape index: {}]   ;;  %s2381_s6 = inlined_call_operand.vmem [shape: f32[1,32], index: 6, kind: input, shape index: {}]   ;;  %s2382_s7 = inlined_call_operand.vmem [shape: f32[32,8], index: 7, kind: input, shape index: {}]   ;;  %s2383_s8 = inlined_call_operand.vmem [shape: f32[1,8], index: 8, kind: input, shape index: {}]   ;;  %s2384_s9 = inlined_call_operand.hbm [shape: f32[2,8,8], index: 9, kind: output, shape index: {}]  }
   0x1   :  { %v37_v0 = vld [vmem:[%s2377_s2] sm:$0xff]  ;;  %v149_v2 = vld [vmem:[%s2379_s4 + $0x8] sm:$0xff]  ;;  %1765 = vmatprep.subr.bf16.mxu1 %v1961_v3  ;;  %v150_v7 = vld [vmem:[%s2379_s4 + $0x10] sm:$0xff] }
   0x2   :  { %v148_v1 = vld [vmem:[%s2379_s4] sm:$0xff]  ;;  %1661 = vmatprep.subr.mxu0 %v37_v0  ;;  %v34_v6 = vld [vmem:[%s2375_s0 + $0x8] sm:$0xff]  ;;  %v151_v8 = vld [vmem:[%s2379_s4 + $0x18] sm:$0xff] }
   0x3   :  { %v2031_v4 = vpack.c.bf16 %v149_v2, %v148_v1  ;;  %v33_v5 = vld [vmem:[%s2375_s0] sm:$0xff]  ;;  %1662 = vmatpush3.msra.mxu0 %v37_v0  ;;  %v2051_v10 = vpack.c.bf16 %v151_v8, %v150_v7 }
   0x4   :  { %1663 = vmatprep.mubr.msk.f32.mxu0 %vm57_vm0, %v33_v5  ;;  %v1585_v9 = vld [vmem:[%s2381_s6] ss:$0 sm:$0xff] }
   0x5   :  { %1767 = vmatpush3.bf16.msra.mxu1 %v2031_v4  ;;  %1664 = vmatmul.mubr.msk.f32.vlgmr.msra.gmra.mrb[0].mxu0 %vm57_vm0, %v34_v6  ;;  %v35_v11 = vld [vmem:[%s2376_s1] sm:$0xff] }
   0x6   :  { %14 = vsyncpa [#allocation4], 0  ;;  %1768 = vmatprep.subr.bf16.mxu1 %v1961_v3  ;;  %vm1962_vm1 = vmmov 0   ;;  %v1963_v12 = vmov 0.0   ;;  %s1964_s4 = smov 64   ;;  %v1965_v13 = vmov 0   ;;  %1771 = vmatprep.subr.bf16.mxu0 %v1961_v3 }
   0x7   :  { %1674 = vmatprep.mubr.msk.f32.mxu1 %vm1962_vm1, %v1963_v12  ;;  %250 = vrot.lane.b32.xlu0 %v1585_v9, %s1964_s4  ;;  %v36_v14 = vld [vmem:[%s2376_s1 + $0x8] sm:$0xff]  ;;  %v1581_v23 = vld [vmem:[%s2378_s3] ss:$0 sm:$0xff]  ;;  %s1966_s3 = smov 96   ;;  %vm310_vm2 = vcmask 1041409   ;;  %vm158_vm3 = vcmask 261120  }
   0x8   :  { %1832 = vset.pattern.permute.xlu1 %v1965_v13  ;;  %1831 = vset.pattern.permute.xlu0 %v1965_v13  ;;  %v1584_v28 = vld [vmem:[%s2380_s5] ss:$0 sm:$0xff]  ;;  %s1967_s5 = smov 32   ;;  %vm465_vm4 = vcmask 254977   ;;  %vm306_vm5 = vcmask 253952   ;;  %vm786_vm6 = vcmask 257027  }
   0x9   :  { %41 = vperm.xlu1 %1832, %v35_v11   ;;  %1770 = vmatpush3.bf16.msra.mxu1 %v2051_v10  ;;  %vm625_vm7 = vcmask 256002   ;;  %vm1108_vm8 = vcmask 259077   ;;  %vm947_vm9 = vcmask 258052   ;;  %vm1269_vm10 = vcmask 260102  }
   0xa   :  { %1773 = vmatpush3.bf16.msra.mxu0 %v2031_v4  ;;  %1685 = vmatprep.mubr.msk.f32.mxu0 %vm1962_vm1, %v1963_v12  ;;  %vm1430_vm11 = vcmask 261127  }
   0xb   :  { %46 = vperm.xlu0 %1831, %v36_v14   ;;  %1774 = vmatprep.subr.bf16.mxu0 %v1961_v3 }
   0xc   :  { %1675 = vmatmul.mubr.f32.vlgmr.msra.gmra.mrb[0].mxu1 %v1963_v12  ;;  %1777 = vmatprep.subr.bf16.mxu1 %v1961_v3 }
   0xd   :  { %1779 = vmatpush3.bf16.msra.mxu1 %v2031_v4  ;;  %1696 = vmatprep.mubr.msk.f32.mxu1 %vm1962_vm1, %v1963_v12 }
   0xe   :  { %1776 = vmatpush3.bf16.msra.mxu0 %v2051_v10  ;;  %1780 = vmatprep.subr.bf16.mxu1 %v1961_v3 }
   0xf   :  { %1783 = vmatprep.subr.bf16.mxu0 %v1961_v3 }
  0x11   :  { %1782 = vmatpush3.bf16.msra.mxu1 %v2051_v10 }
  0x12   :  { %1789 = vmatprep.subr.bf16.mxu1 %v1961_v3 }
  0x79   :  { %v2079_v17 = vpop.permute.xlu0 %250 }
  0x88   :  { %v42_v25 = vpop.permute.xlu1 %41 }
  0x89   :  { %v55_v26 = vmul.f32 %v1581_v23, %v42_v25 }
  0x8a   :  { %v47_v22 = vpop.permute.xlu0 %46 }
  0x8b   :  { %v56_v24 = vmul.f32 %v1581_v23, %v47_v22 }
  0xd8   :  { %v1665_v15 = vpop.f32.mrb[0].mxu0 }
  0xd9   :  { %v130_v16 = vpop.f32.mrb[1].mxu0  ;;  %v136_v27 = vadd.f32 %v1665_v15, %v56_v24 }
  0xda   :  { %v131_v30 = vadd.f32 %v130_v16, %v55_v26 }
  0xdb   :  { %v2090_v29 = vadd.f32 %v1584_v28, %v136_v27 }
  0xdc   :  { %v2092_v32 = vadd.f32 %v1584_v28, %v131_v30 }
  0xdf   :  { %v228_v18 = vpop.f32.mrb[0].mxu1 }
  0xe0   :  { %v253_v19 = vadd.f32 %v2079_v17, %v228_v18  ;;  %v1676_v20 = vpop.f32.mrb[1].mxu1  ;;  %v233_v31 = vrot.slane %v228_v18, 1  ;;  %v236_v34 = vadd.f32 %v228_v18, %v2092_v32 }
  0xe2   :  { %v255_v21 = vrot.slane %v253_v19, 1  ;;  %v237_v33 = vadd.f32 %v233_v31, %v2090_v29  ;;  %v1586_v36 = vmul.f32 -1.442695, %v236_v34 }
  0xe4   :  { %258 = vrot.lane.b32.xlu1 %v255_v21, %s1964_s4  ;;  %v1587_v35 = vmul.f32 -1.442695, %v237_v33 }
  0xe6   :  { %1833 = vpow2.f32 %v1587_v35 }
  0xe7   :  { %1835 = vpow2.f32 %v1586_v36 }
  0xe8   :  { %256 = vrot.lane.b32.xlu1 %v253_v19, %s1964_s4 }
  0xf0   :  { %v1834_v37 = vpop.eup %1833 }
  0xf1   :  { %v245_v38 = vadd.f32 1.0, %v1834_v37  ;;  %v1836_v39 = vpop.eup %1835 }
  0xf2   :  { %v244_v40 = vadd.f32 1.0, %v1836_v39 }
  0xf3   :  { %1837 = vrcp.f32 %v245_v38 }
  0xf4   :  { %1839 = vrcp.f32 %v244_v40 }
  0xfd   :  { %v1838_v41 = vpop.eup %1837 }
  0xfe   :  { %v1840_v44 = vpop.eup %1839 }
 0x156   :  { %v259_v42 = vpop.permute.xlu1 %258 }
 0x157   :  { %v263_v43 = vmul.f32 %v1838_v41, %v259_v42 }
 0x159   :  { %268 = vrot.lane.b32.xlu0 %v263_v43, %s1964_s4 }
 0x15a   :  { %v257_v45 = vpop.permute.xlu1 %256 }
 0x15b   :  { %v262_v46 = vmul.f32 %v1840_v44, %v257_v45 }
 0x15d   :  { %266 = vrot.lane.b32.xlu1 %v262_v46, %s1964_s4 }
 0x1cb   :  { %v269_v47 = vpop.permute.xlu0 %268 }
 0x1cc   :  { %v273_v48 = vadd.f32 %v269_v47, %v2090_v29 }
 0x1ce   :  { %1841 = vtanh.f32 %v273_v48 }
 0x1cf   :  { %v267_v49 = vpop.permute.xlu1 %266 }
 0x1d0   :  { %v272_v50 = vadd.f32 %v267_v49, %v2092_v32 }
 0x1d2   :  { %1843 = vtanh.f32 %v272_v50 }
 0x1d8   :  { %v1842_v51 = vpop.eup %1841 }
 0x1d9   :  { %v277_v52 = vsub.f32 0.0, %v1842_v51 }
 0x1db   :  { %282 = vrot.lane.b32.xlu0 %v277_v52, %s1966_s3 }
 0x1dc   :  { %v1844_v53 = vpop.eup %1843 }
 0x1dd   :  { %v276_v54 = vsub.f32 0.0, %v1844_v53 }
 0x1df   :  { %280 = vrot.lane.b32.xlu1 %v276_v54, %s1966_s3 }
 0x24d   :  { %v283_v55 = vpop.permute.xlu0 %282 }
 0x24e   :  { %v287_v56 = vmul.f32 %v1838_v41, %v283_v55 }
 0x250   :  { %292 = vrot.lane.b32.xlu0 %v287_v56, %s1967_s5 }
 0x251   :  { %v281_v57 = vpop.permute.xlu1 %280 }
 0x252   :  { %v286_v58 = vmul.f32 %v1840_v44, %v281_v57 }
 0x254   :  { %290 = vrot.lane.b32.xlu1 %v286_v58, %s1967_s5 }
 0x2c2   :  { %v293_v59 = vpop.permute.xlu0 %292 }
 0x2c3   :  { %v2104_v60 = vadd.f32 %v1842_v51, %v293_v59 }
 0x2c5   :  { %v309_v62 = vrot.slane %v2104_v60, 7 }
 0x2c6   :  { %v291_v61 = vpop.permute.xlu1 %290 }
 0x2c7   :  { %v2107_v63 = vadd.f32 %v1844_v53, %v291_v61 }
 0x2c9   :  { %v311_v0 = vsel %vm310_vm2, %v309_v62, %v2107_v63 }
 0x2ca   :  { %312 = vrot.lane.b32.xlu0 %v311_v0, %s1964_s4 }
 0x33c   :  { %v313_v1 = vpop.permute.xlu0 %312 }
 0x33d   :  { %1686 = vmatmul.mubr.msk.f32.vlgmr.msra.gmra.mrb[2].mxu0 %vm158_vm3, %v313_v1 }
 0x33e   :  { %1785 = vmatpush3.bf16.msra.mxu0 %v2031_v4  ;;  %1707 = vmatprep.mubr.msk.f32.mxu0 %vm1962_vm1, %v1963_v12 }
 0x33f   :  { %1786 = vmatprep.subr.bf16.mxu0 %v1961_v3 }
 0x342   :  { %1788 = vmatpush3.bf16.msra.mxu0 %v2051_v10 }
 0x343   :  { %1795 = vmatprep.subr.bf16.mxu0 %v1961_v3 }
 0x410   :  { %v382_v2 = vpop.f32.mrb[2].mxu0 }
 0x411   :  { %v404_v5 = vadd.f32 %v382_v2, %v2079_v17  ;;  %v1687_v6 = vpop.f32.mrb[3].mxu0  ;;  %v387_v8 = vrot.slane %v382_v2, 7  ;;  %v391_v9 = vadd.f32 %v382_v2, %v2090_v29 }
 0x413   :  { %409 = vrot.lane.b32.xlu0 %v404_v5, %s1964_s4  ;;  %v406_v7 = vrot.slane %v404_v5, 7  ;;  %v390_v11 = vadd.f32 %v387_v8, %v2092_v32  ;;  %v1590_v13 = vmul.f32 -1.442695, %v391_v9 }
 0x415   :  { %407 = vrot.lane.b32.xlu1 %v406_v7, %s1964_s4  ;;  %v1589_v14 = vmul.f32 -1.442695, %v390_v11  ;;  %1845 = vpow2.f32 %v1590_v13 }
 0x417   :  { %1847 = vpow2.f32 %v1589_v14 }
 0x41f   :  { %v1846_v15 = vpop.eup %1845 }
 0x420   :  { %v399_v18 = vadd.f32 1.0, %v1846_v15 }
 0x421   :  { %v1848_v16 = vpop.eup %1847 }
 0x422   :  { %v398_v19 = vadd.f32 1.0, %v1848_v16  ;;  %1849 = vrcp.f32 %v399_v18 }
 0x424   :  { %1851 = vrcp.f32 %v398_v19 }
 0x42c   :  { %v1850_v20 = vpop.eup %1849 }
 0x42e   :  { %v1852_v23 = vpop.eup %1851 }
 0x485   :  { %v410_v21 = vpop.permute.xlu0 %409 }
 0x486   :  { %v414_v22 = vmul.f32 %v1850_v20, %v410_v21 }
 0x487   :  { %v408_v24 = vpop.permute.xlu1 %407 }
 0x488   :  { %v413_v25 = vmul.f32 %v1852_v23, %v408_v24  ;;  %419 = vrot.lane.b32.xlu0 %v414_v22, %s1964_s4 }
 0x48a   :  { %417 = vrot.lane.b32.xlu1 %v413_v25, %s1964_s4 }
 0x4fa   :  { %v420_v26 = vpop.permute.xlu0 %419 }
 0x4fb   :  { %v424_v27 = vadd.f32 %v420_v26, %v2090_v29 }
 0x4fc   :  { %v418_v28 = vpop.permute.xlu1 %417 }
 0x4fd   :  { %1853 = vtanh.f32 %v424_v27  ;;  %v423_v30 = vadd.f32 %v418_v28, %v2092_v32 }
 0x4ff   :  { %1855 = vtanh.f32 %v423_v30 }
 0x507   :  { %v1854_v31 = vpop.eup %1853 }
 0x508   :  { %v430_v33 = vrot.slane %v1854_v31, 1 }
 0x509   :  { %v1856_v34 = vpop.eup %1855 }
 0x50a   :  { %v434_v35 = vsub.f32 %v2104_v60, %v430_v33  ;;  %v429_v36 = vrot.slane %v1856_v34, 1 }
 0x50c   :  { %v438_v37 = vrot.slane %v434_v35, 7  ;;  %v433_v38 = vsub.f32 %v2107_v63, %v429_v36 }
 0x50e   :  { %441 = vrot.lane.b32.xlu0 %v438_v37, %s1966_s3  ;;  %v437_v39 = vrot.slane %v433_v38, 7 }
 0x510   :  { %439 = vrot.lane.b32.xlu1 %v437_v39, %s1966_s3 }
 0x580   :  { %v442_v40 = vpop.permute.xlu0 %441 }
 0x581   :  { %v446_v41 = vmul.f32 %v1850_v20, %v442_v40 }
 0x582   :  { %v440_v42 = vpop.permute.xlu1 %439 }
 0x583   :  { %v445_v43 = vmul.f32 %v1852_v23, %v440_v42  ;;  %451 = vrot.lane.b32.xlu0 %v446_v41, %s1967_s5 }
 0x585   :  { %449 = vrot.lane.b32.xlu1 %v445_v43, %s1967_s5 }
 0x5f5   :  { %v452_v44 = vpop.permute.xlu0 %451 }
 0x5f6   :  { %v2136_v47 = vadd.f32 %v1854_v31, %v452_v44 }
 0x5f7   :  { %v450_v45 = vpop.permute.xlu1 %449 }
 0x5f8   :  { %v2134_v46 = vadd.f32 %v1856_v34, %v450_v45 }
 0x5fa   :  { %v468_v48 = vrot.slane %v2134_v46, 1 }
 0x5fc   :  { %v469_v49 = vsel %vm310_vm2, %v2136_v47, %v468_v48 }
 0x5fd   :  { %470 = vrot.lane.b32.xlu1 %v469_v49, %s1964_s4 }
 0x66f   :  { %v471_v50 = vpop.permute.xlu1 %470 }
 0x670   :  { %1697 = vmatmul.mubr.msk.f32.vlgmr.msra.gmra.mrb[2].mxu1 %vm158_vm3, %v471_v50 }
 0x671   :  { %1791 = vmatpush3.bf16.msra.mxu1 %v2031_v4  ;;  %1718 = vmatprep.mubr.msk.f32.mxu1 %vm1962_vm1, %v1963_v12 }
 0x672   :  { %1792 = vmatprep.subr.bf16.mxu1 %v1961_v3 }
 0x675   :  { %1794 = vmatpush3.bf16.msra.mxu1 %v2051_v10 }
 0x676   :  { %1801 = vmatprep.subr.bf16.mxu1 %v1961_v3 }
 0x743   :  { %v540_v51 = vpop.f32.mrb[2].mxu1 }
 0x744   :  { %v563_v52 = vadd.f32 %v540_v51, %v2079_v17  ;;  %v1698_v53 = vpop.f32.mrb[3].mxu1  ;;  %v545_v56 = vrot.slane %v540_v51, 6  ;;  %v546_v57 = vrot.slane %v540_v51, 7 }
 0x746   :  { %v566_v54 = vrot.slane %v563_v52, 7  ;;  %v565_v55 = vrot.slane %v563_v52, 6  ;;  %v549_v58 = vadd.f32 %v545_v56, %v2092_v32  ;;  %v550_v59 = vadd.f32 %v546_v57, %v2090_v29 }
 0x748   :  { %569 = vrot.lane.b32.xlu1 %v566_v54, %s1964_s4  ;;  %567 = vrot.lane.b32.xlu0 %v565_v55, %s1964_s4  ;;  %v1592_v61 = vmul.f32 -1.442695, %v549_v58  ;;  %v1593_v62 = vmul.f32 -1.442695, %v550_v59 }
 0x74a   :  { %1857 = vpow2.f32 %v1592_v61 }
 0x74b   :  { %1859 = vpow2.f32 %v1593_v62 }
 0x754   :  { %v1858_v0 = vpop.eup %1857 }
 0x755   :  { %v1860_v1 = vpop.eup %1859  ;;  %v557_v2 = vadd.f32 1.0, %v1858_v0 }
 0x756   :  { %v558_v5 = vadd.f32 1.0, %v1860_v1 }
 0x757   :  { %1861 = vrcp.f32 %v557_v2 }
 0x758   :  { %1863 = vrcp.f32 %v558_v5 }
 0x761   :  { %v1862_v6 = vpop.eup %1861 }
 0x762   :  { %v1864_v7 = vpop.eup %1863 }
 0x7ba   :  { %v570_v8 = vpop.permute.xlu1 %569  ;;  %v568_v9 = vpop.permute.xlu0 %567 }
 0x7bb   :  { %v574_v11 = vmul.f32 %v1864_v7, %v570_v8  ;;  %v573_v13 = vmul.f32 %v1862_v6, %v568_v9 }
 0x7bd   :  { %579 = vrot.lane.b32.xlu1 %v574_v11, %s1964_s4  ;;  %577 = vrot.lane.b32.xlu0 %v573_v13, %s1964_s4 }
 0x82f   :  { %v580_v14 = vpop.permute.xlu1 %579  ;;  %v578_v15 = vpop.permute.xlu0 %577 }
 0x830   :  { %v584_v16 = vadd.f32 %v580_v14, %v2090_v29  ;;  %v583_v18 = vadd.f32 %v578_v15, %v2092_v32 }
 0x832   :  { %1865 = vtanh.f32 %v584_v16 }
 0x833   :  { %1867 = vtanh.f32 %v583_v18 }
 0x83c   :  { %v1866_v19 = vpop.eup %1865 }
 0x83d   :  { %v1868_v20 = vpop.eup %1867  ;;  %v590_v21 = vrot.slane %v1866_v19, 1 }
 0x83e   :  { %v589_v22 = vrot.slane %v1868_v20, 1 }
 0x83f   :  { %v594_v23 = vsub.f32 %v2136_v47, %v590_v21 }
 0x840   :  { %v593_v24 = vsub.f32 %v2134_v46, %v589_v22 }
 0x841   :  { %v598_v25 = vrot.slane %v594_v23, 7 }
 0x842   :  { %v597_v26 = vrot.slane %v593_v24, 7 }
 0x843   :  { %601 = vrot.lane.b32.xlu1 %v598_v25, %s1966_s3 }
 0x844   :  { %599 = vrot.lane.b32.xlu0 %v597_v26, %s1966_s3 }
 0x8b5   :  { %v602_v27 = vpop.permute.xlu1 %601 }
 0x8b6   :  { %v606_v28 = vmul.f32 %v1864_v7, %v602_v27  ;;  %v600_v30 = vpop.permute.xlu0 %599 }
 0x8b7   :  { %v605_v31 = vmul.f32 %v1862_v6, %v600_v30 }
 0x8b8   :  { %611 = vrot.lane.b32.xlu1 %v606_v28, %s1967_s5 }
 0x8b9   :  { %609 = vrot.lane.b32.xlu0 %v605_v31, %s1967_s5 }
 0x92a   :  { %v612_v33 = vpop.permute.xlu1 %611 }
 0x92b   :  { %v2164_v34 = vadd.f32 %v1866_v19, %v612_v33  ;;  %v610_v35 = vpop.permute.xlu0 %609 }
 0x92c   :  { %v2166_v36 = vadd.f32 %v1868_v20, %v610_v35 }
 0x92d   :  { %v629_v37 = vrot.slane %v2164_v34, 1 }
 0x92e   :  { %v628_v38 = vrot.slane %v2166_v36, 2 }
 0x930   :  { %v630_v39 = vsel %vm310_vm2, %v629_v37, %v628_v38 }
 0x931   :  { %631 = vrot.lane.b32.xlu0 %v630_v39, %s1964_s4 }
 0x9a3   :  { %v632_v40 = vpop.permute.xlu0 %631 }
 0x9a4   :  { %1708 = vmatmul.mubr.msk.f32.vlgmr.msra.gmra.mrb[4].mxu0 %vm158_vm3, %v632_v40 }
 0x9a5   :  { %1797 = vmatpush3.bf16.msra.mxu0 %v2031_v4  ;;  %1729 = vmatprep.mubr.msk.f32.mxu0 %vm1962_vm1, %v1963_v12 }
 0x9a6   :  { %1798 = vmatprep.subr.bf16.mxu0 %v1961_v3 }
 0x9a9   :  { %1800 = vmatpush3.bf16.msra.mxu0 %v2051_v10 }
 0x9aa   :  { %1807 = vmatprep.subr.bf16.mxu0 %v1961_v3 }
 0xa77   :  { %v701_v41 = vpop.f32.mrb[4].mxu0 }
 0xa78   :  { %v724_v42 = vadd.f32 %v701_v41, %v2079_v17  ;;  %v1709_v43 = vpop.f32.mrb[5].mxu0  ;;  %v706_v48 = vrot.slane %v701_v41, 5  ;;  %v707_v49 = vrot.slane %v701_v41, 6 }
 0xa7a   :  { %v727_v44 = vrot.slane %v724_v42, 6  ;;  %v726_v45 = vrot.slane %v724_v42, 5  ;;  %v710_v50 = vadd.f32 %v706_v48, %v2092_v32  ;;  %v711_v51 = vadd.f32 %v707_v49, %v2090_v29 }
 0xa7c   :  { %730 = vrot.lane.b32.xlu0 %v727_v44, %s1964_s4  ;;  %728 = vrot.lane.b32.xlu1 %v726_v45, %s1964_s4  ;;  %v1595_v52 = vmul.f32 -1.442695, %v710_v50  ;;  %v1596_v53 = vmul.f32 -1.442695, %v711_v51 }
 0xa7e   :  { %1869 = vpow2.f32 %v1595_v52 }
 0xa7f   :  { %1871 = vpow2.f32 %v1596_v53 }
 0xa88   :  { %v1870_v54 = vpop.eup %1869 }
 0xa89   :  { %v1872_v55 = vpop.eup %1871  ;;  %v718_v56 = vadd.f32 1.0, %v1870_v54 }
 0xa8a   :  { %v719_v57 = vadd.f32 1.0, %v1872_v55 }
 0xa8b   :  { %1873 = vrcp.f32 %v718_v56 }
 0xa8c   :  { %1875 = vrcp.f32 %v719_v57 }
 0xa95   :  { %v1874_v58 = vpop.eup %1873 }
 0xa96   :  { %v1876_v59 = vpop.eup %1875 }
 0xaee   :  { %v731_v61 = vpop.permute.xlu0 %730  ;;  %v729_v62 = vpop.permute.xlu1 %728 }
 0xaef   :  { %v735_v0 = vmul.f32 %v1876_v59, %v731_v61  ;;  %v734_v1 = vmul.f32 %v1874_v58, %v729_v62 }
 0xaf1   :  { %740 = vrot.lane.b32.xlu0 %v735_v0, %s1964_s4  ;;  %738 = vrot.lane.b32.xlu1 %v734_v1, %s1964_s4 }
 0xb63   :  { %v741_v2 = vpop.permute.xlu0 %740  ;;  %v739_v5 = vpop.permute.xlu1 %738 }
 0xb64   :  { %v745_v6 = vadd.f32 %v741_v2, %v2090_v29  ;;  %v744_v7 = vadd.f32 %v739_v5, %v2092_v32 }
 0xb66   :  { %1877 = vtanh.f32 %v745_v6 }
 0xb67   :  { %1879 = vtanh.f32 %v744_v7 }
 0xb70   :  { %v1878_v8 = vpop.eup %1877 }
 0xb71   :  { %v1880_v9 = vpop.eup %1879  ;;  %v751_v11 = vrot.slane %v1878_v8, 1 }
 0xb72   :  { %v750_v13 = vrot.slane %v1880_v9, 1 }
 0xb73   :  { %v755_v14 = vsub.f32 %v2164_v34, %v751_v11 }
 0xb74   :  { %v754_v15 = vsub.f32 %v2166_v36, %v750_v13 }
 0xb75   :  { %v759_v16 = vrot.slane %v755_v14, 7 }
 0xb76   :  { %v758_v18 = vrot.slane %v754_v15, 7 }
 0xb77   :  { %762 = vrot.lane.b32.xlu0 %v759_v16, %s1966_s3 }
 0xb78   :  { %760 = vrot.lane.b32.xlu1 %v758_v18, %s1966_s3 }
 0xbe9   :  { %v763_v19 = vpop.permute.xlu0 %762 }
 0xbea   :  { %v767_v20 = vmul.f32 %v1876_v59, %v763_v19  ;;  %v761_v21 = vpop.permute.xlu1 %760 }
 0xbeb   :  { %v766_v22 = vmul.f32 %v1874_v58, %v761_v21 }
 0xbec   :  { %772 = vrot.lane.b32.xlu0 %v767_v20, %s1967_s5 }
 0xbed   :  { %770 = vrot.lane.b32.xlu1 %v766_v22, %s1967_s5 }
 0xc5e   :  { %v773_v23 = vpop.permute.xlu0 %772 }
 0xc5f   :  { %v2194_v24 = vadd.f32 %v1878_v8, %v773_v23  ;;  %v771_v25 = vpop.permute.xlu1 %770 }
 0xc60   :  { %v2196_v26 = vadd.f32 %v1880_v9, %v771_v25 }
 0xc61   :  { %v790_v27 = vrot.slane %v2194_v24, 2 }
 0xc62   :  { %v789_v28 = vrot.slane %v2196_v26, 3 }
 0xc64   :  { %v791_v30 = vsel %vm310_vm2, %v790_v27, %v789_v28 }
 0xc65   :  { %792 = vrot.lane.b32.xlu1 %v791_v30, %s1964_s4 }
 0xcd7   :  { %v793_v31 = vpop.permute.xlu1 %792 }
 0xcd8   :  { %1719 = vmatmul.mubr.msk.f32.vlgmr.msra.gmra.mrb[4].mxu1 %vm158_vm3, %v793_v31 }
 0xcd9   :  { %1803 = vmatpush3.bf16.msra.mxu1 %v2031_v4  ;;  %1740 = vmatprep.mubr.msk.f32.mxu1 %vm1962_vm1, %v1963_v12 }
 0xcda   :  { %1804 = vmatprep.subr.bf16.mxu1 %v1961_v3 }
 0xcdd   :  { %1806 = vmatpush3.bf16.msra.mxu1 %v2051_v10 }
 0xdab   :  { %v862_v33 = vpop.f32.mrb[4].mxu1 }
 0xdac   :  { %v885_v35 = vadd.f32 %v862_v33, %v2079_v17  ;;  %v1720_v37 = vpop.f32.mrb[5].mxu1  ;;  %v867_v40 = vrot.slane %v862_v33, 4  ;;  %v868_v41 = vrot.slane %v862_v33, 5 }
 0xdae   :  { %v888_v38 = vrot.slane %v885_v35, 5  ;;  %v887_v39 = vrot.slane %v885_v35, 4  ;;  %v871_v42 = vadd.f32 %v867_v40, %v2092_v32  ;;  %v872_v43 = vadd.f32 %v868_v41, %v2090_v29 }
 0xdb0   :  { %891 = vrot.lane.b32.xlu1 %v888_v38, %s1964_s4  ;;  %889 = vrot.lane.b32.xlu0 %v887_v39, %s1964_s4  ;;  %v1598_v44 = vmul.f32 -1.442695, %v871_v42  ;;  %v1599_v45 = vmul.f32 -1.442695, %v872_v43 }
 0xdb2   :  { %1881 = vpow2.f32 %v1598_v44 }
 0xdb3   :  { %1883 = vpow2.f32 %v1599_v45 }
 0xdbc   :  { %v1882_v48 = vpop.eup %1881 }
 0xdbd   :  { %v1884_v49 = vpop.eup %1883  ;;  %v879_v50 = vadd.f32 1.0, %v1882_v48 }
 0xdbe   :  { %v880_v51 = vadd.f32 1.0, %v1884_v49 }
 0xdbf   :  { %1885 = vrcp.f32 %v879_v50 }
 0xdc0   :  { %1887 = vrcp.f32 %v880_v51 }
 0xdc9   :  { %v1886_v52 = vpop.eup %1885 }
 0xdca   :  { %v1888_v53 = vpop.eup %1887 }
 0xe22   :  { %v892_v54 = vpop.permute.xlu1 %891  ;;  %v890_v55 = vpop.permute.xlu0 %889 }
 0xe23   :  { %v896_v56 = vmul.f32 %v1888_v53, %v892_v54  ;;  %v895_v57 = vmul.f32 %v1886_v52, %v890_v55 }
 0xe25   :  { %901 = vrot.lane.b32.xlu1 %v896_v56, %s1964_s4  ;;  %899 = vrot.lane.b32.xlu0 %v895_v57, %s1964_s4 }
 0xe97   :  { %v902_v58 = vpop.permute.xlu1 %901  ;;  %v900_v59 = vpop.permute.xlu0 %899 }
 0xe98   :  { %v906_v61 = vadd.f32 %v902_v58, %v2090_v29  ;;  %v905_v62 = vadd.f32 %v900_v59, %v2092_v32 }
 0xe9a   :  { %1889 = vtanh.f32 %v906_v61 }
 0xe9b   :  { %1891 = vtanh.f32 %v905_v62 }
 0xea4   :  { %v1890_v0 = vpop.eup %1889 }
 0xea5   :  { %v1892_v1 = vpop.eup %1891  ;;  %v912_v2 = vrot.slane %v1890_v0, 1 }
 0xea6   :  { %v911_v5 = vrot.slane %v1892_v1, 1 }
 0xea7   :  { %v916_v6 = vsub.f32 %v2194_v24, %v912_v2 }
 0xea8   :  { %v915_v7 = vsub.f32 %v2196_v26, %v911_v5 }
 0xea9   :  { %v920_v8 = vrot.slane %v916_v6, 7 }
 0xeaa   :  { %v919_v9 = vrot.slane %v915_v7, 7 }
 0xeab   :  { %923 = vrot.lane.b32.xlu1 %v920_v8, %s1966_s3 }
 0xeac   :  { %921 = vrot.lane.b32.xlu0 %v919_v9, %s1966_s3 }
 0xf1d   :  { %v924_v11 = vpop.permute.xlu1 %923 }
 0xf1e   :  { %v928_v13 = vmul.f32 %v1888_v53, %v924_v11  ;;  %v922_v14 = vpop.permute.xlu0 %921 }
 0xf1f   :  { %v927_v15 = vmul.f32 %v1886_v52, %v922_v14 }
 0xf20   :  { %933 = vrot.lane.b32.xlu1 %v928_v13, %s1967_s5 }
 0xf21   :  { %931 = vrot.lane.b32.xlu0 %v927_v15, %s1967_s5 }
 0xf92   :  { %v934_v16 = vpop.permute.xlu1 %933 }
 0xf93   :  { %v2223_v18 = vadd.f32 %v1890_v0, %v934_v16  ;;  %v932_v19 = vpop.permute.xlu0 %931 }
 0xf94   :  { %v2225_v20 = vadd.f32 %v1892_v1, %v932_v19 }
 0xf95   :  { %v951_v21 = vrot.slane %v2223_v18, 3 }
 0xf96   :  { %v950_v22 = vrot.slane %v2225_v20, 4 }
 0xf98   :  { %v952_v23 = vsel %vm310_vm2, %v951_v21, %v950_v22 }
 0xf99   :  { %953 = vrot.lane.b32.xlu0 %v952_v23, %s1964_s4 }
0x100b   :  { %v954_v25 = vpop.permute.xlu0 %953 }
0x100c   :  { %1730 = vmatmul.mubr.msk.f32.vlgmr.msra.gmra.mrb[6].mxu0 %vm158_vm3, %v954_v25 }
0x100d   :  { %1809 = vmatpush3.bf16.msra.mxu0 %v2031_v4  ;;  %1751 = vmatprep.mubr.msk.f32.mxu0 %vm1962_vm1, %v1963_v12 }
0x100e   :  { %1810 = vmatprep.subr.bf16.mxu0 %v1961_v3 }
0x1011   :  { %1812 = vmatpush3.bf16.msra.mxu0 %v2051_v10 }
0x10df   :  { %v1023_v27 = vpop.f32.mrb[6].mxu0 }
0x10e0   :  { %v1046_v28 = vadd.f32 %v1023_v27, %v2079_v17  ;;  %v1731_v30 = vpop.f32.mrb[7].mxu0  ;;  %v1028_v35 = vrot.slane %v1023_v27, 3  ;;  %v1029_v37 = vrot.slane %v1023_v27, 4 }
0x10e2   :  { %v1049_v31 = vrot.slane %v1046_v28, 4  ;;  %v1048_v33 = vrot.slane %v1046_v28, 3  ;;  %v1032_v4 = vadd.f32 %v1028_v35, %v2092_v32  ;;  %v1033_v12 = vadd.f32 %v1029_v37, %v2090_v29 }
0x10e4   :  { %1052 = vrot.lane.b32.xlu0 %v1049_v31, %s1964_s4  ;;  %1050 = vrot.lane.b32.xlu1 %v1048_v33, %s1964_s4  ;;  %v1601_v38 = vmul.f32 -1.442695, %v1032_v4  ;;  %v1602_v3 = vmul.f32 -1.442695, %v1033_v12 }
0x10e6   :  { %1893 = vpow2.f32 %v1601_v38 }
0x10e7   :  { %1895 = vpow2.f32 %v1602_v3 }
0x10f0   :  { %v1894_v10 = vpop.eup %1893 }
0x10f1   :  { %v1896_v39 = vpop.eup %1895  ;;  %v1040_v40 = vadd.f32 1.0, %v1894_v10 }
0x10f2   :  { %v1041_v41 = vadd.f32 1.0, %v1896_v39 }
0x10f3   :  { %1897 = vrcp.f32 %v1040_v40 }
0x10f4   :  { %1899 = vrcp.f32 %v1041_v41 }
0x10fd   :  { %v1898_v42 = vpop.eup %1897 }
0x10fe   :  { %v1900_v43 = vpop.eup %1899 }
0x1156   :  { %v1053_v44 = vpop.permute.xlu0 %1052  ;;  %v1051_v45 = vpop.permute.xlu1 %1050 }
0x1157   :  { %v1057_v48 = vmul.f32 %v1900_v43, %v1053_v44  ;;  %v1056_v49 = vmul.f32 %v1898_v42, %v1051_v45 }
0x1159   :  { %1062 = vrot.lane.b32.xlu0 %v1057_v48, %s1964_s4  ;;  %1060 = vrot.lane.b32.xlu1 %v1056_v49, %s1964_s4 }
0x11cb   :  { %v1063_v50 = vpop.permute.xlu0 %1062  ;;  %v1061_v51 = vpop.permute.xlu1 %1060 }
0x11cc   :  { %v1067_v52 = vadd.f32 %v1063_v50, %v2090_v29  ;;  %v1066_v53 = vadd.f32 %v1061_v51, %v2092_v32 }
0x11ce   :  { %1901 = vtanh.f32 %v1067_v52 }
0x11cf   :  { %1903 = vtanh.f32 %v1066_v53 }
0x11d8   :  { %v1902_v54 = vpop.eup %1901 }
0x11d9   :  { %v1904_v55 = vpop.eup %1903  ;;  %v1073_v56 = vrot.slane %v1902_v54, 1 }
0x11da   :  { %v1072_v57 = vrot.slane %v1904_v55, 1 }
0x11db   :  { %v1077_v58 = vsub.f32 %v2223_v18, %v1073_v56 }
0x11dc   :  { %v1076_v59 = vsub.f32 %v2225_v20, %v1072_v57 }
0x11dd   :  { %v1081_v61 = vrot.slane %v1077_v58, 7 }
0x11de   :  { %v1080_v62 = vrot.slane %v1076_v59, 7 }
0x11df   :  { %1084 = vrot.lane.b32.xlu0 %v1081_v61, %s1966_s3 }
0x11e0   :  { %1082 = vrot.lane.b32.xlu1 %v1080_v62, %s1966_s3 }
0x1251   :  { %v1085_v0 = vpop.permute.xlu0 %1084 }
0x1252   :  { %v1089_v1 = vmul.f32 %v1900_v43, %v1085_v0  ;;  %v1083_v2 = vpop.permute.xlu1 %1082 }
0x1253   :  { %v1088_v5 = vmul.f32 %v1898_v42, %v1083_v2 }
0x1254   :  { %1094 = vrot.lane.b32.xlu0 %v1089_v1, %s1967_s5 }
0x1255   :  { %1092 = vrot.lane.b32.xlu1 %v1088_v5, %s1967_s5 }
0x12c6   :  { %v1095_v6 = vpop.permute.xlu0 %1094 }
0x12c7   :  { %v2252_v7 = vadd.f32 %v1902_v54, %v1095_v6  ;;  %v1093_v8 = vpop.permute.xlu1 %1092 }
0x12c8   :  { %v2254_v9 = vadd.f32 %v1904_v55, %v1093_v8 }
0x12c9   :  { %v1112_v11 = vrot.slane %v2252_v7, 4 }
0x12ca   :  { %v1111_v13 = vrot.slane %v2254_v9, 5 }
0x12cc   :  { %v1113_v14 = vsel %vm310_vm2, %v1112_v11, %v1111_v13 }
0x12cd   :  { %1114 = vrot.lane.b32.xlu1 %v1113_v14, %s1964_s4 }
0x133f   :  { %v1115_v15 = vpop.permute.xlu1 %1114 }
0x1340   :  { %1741 = vmatmul.mubr.msk.f32.vlgmr.msra.gmra.mrb[6].mxu1 %vm158_vm3, %v1115_v15 }
0x1413   :  { %v1184_v16 = vpop.f32.mrb[6].mxu1 }
0x1414   :  { %v1207_v19 = vadd.f32 %v1184_v16, %v2079_v17  ;;  %v1742_v21 = vpop.f32.mrb[7].mxu1  ;;  %v1189_v25 = vrot.slane %v1184_v16, 2  ;;  %v1190_v27 = vrot.slane %v1184_v16, 3 }
0x1416   :  { %v1210_v22 = vrot.slane %v1207_v19, 3  ;;  %v1209_v23 = vrot.slane %v1207_v19, 2  ;;  %v1193_v28 = vadd.f32 %v1189_v25, %v2092_v32  ;;  %v1194_v30 = vadd.f32 %v1190_v27, %v2090_v29 }
0x1418   :  { %1213 = vrot.lane.b32.xlu1 %v1210_v22, %s1964_s4  ;;  %1211 = vrot.lane.b32.xlu0 %v1209_v23, %s1964_s4  ;;  %v1604_v31 = vmul.f32 -1.442695, %v1193_v28  ;;  %v1605_v33 = vmul.f32 -1.442695, %v1194_v30 }
0x141a   :  { %1905 = vpow2.f32 %v1604_v31 }
0x141b   :  { %1907 = vpow2.f32 %v1605_v33 }
0x1424   :  { %v1906_v35 = vpop.eup %1905 }
0x1425   :  { %v1908_v37 = vpop.eup %1907  ;;  %v1201_v4 = vadd.f32 1.0, %v1906_v35 }
0x1426   :  { %v1202_v12 = vadd.f32 1.0, %v1908_v37 }
0x1427   :  { %1909 = vrcp.f32 %v1201_v4 }
0x1428   :  { %1911 = vrcp.f32 %v1202_v12 }
0x1431   :  { %v1910_v38 = vpop.eup %1909 }
0x1432   :  { %v1912_v3 = vpop.eup %1911 }
0x148a   :  { %v1214_v10 = vpop.permute.xlu1 %1213  ;;  %v1212_v39 = vpop.permute.xlu0 %1211 }
0x148b   :  { %v1218_v40 = vmul.f32 %v1912_v3, %v1214_v10  ;;  %v1217_v41 = vmul.f32 %v1910_v38, %v1212_v39 }
0x148d   :  { %1223 = vrot.lane.b32.xlu1 %v1218_v40, %s1964_s4  ;;  %1221 = vrot.lane.b32.xlu0 %v1217_v41, %s1964_s4 }
0x14ff   :  { %v1224_v42 = vpop.permute.xlu1 %1223  ;;  %v1222_v43 = vpop.permute.xlu0 %1221 }
0x1500   :  { %v1228_v44 = vadd.f32 %v1224_v42, %v2090_v29  ;;  %v1227_v45 = vadd.f32 %v1222_v43, %v2092_v32 }
0x1502   :  { %1913 = vtanh.f32 %v1228_v44 }
0x1503   :  { %1915 = vtanh.f32 %v1227_v45 }
0x150c   :  { %v1914_v48 = vpop.eup %1913 }
0x150d   :  { %v1916_v49 = vpop.eup %1915  ;;  %v1234_v50 = vrot.slane %v1914_v48, 1 }
0x150e   :  { %v1233_v51 = vrot.slane %v1916_v49, 1 }
0x150f   :  { %v1238_v52 = vsub.f32 %v2252_v7, %v1234_v50 }
0x1510   :  { %v1237_v53 = vsub.f32 %v2254_v9, %v1233_v51 }
0x1511   :  { %v1242_v54 = vrot.slane %v1238_v52, 7 }
0x1512   :  { %v1241_v55 = vrot.slane %v1237_v53, 7 }
0x1513   :  { %1245 = vrot.lane.b32.xlu1 %v1242_v54, %s1966_s3 }
0x1514   :  { %1243 = vrot.lane.b32.xlu0 %v1241_v55, %s1966_s3 }
0x1585   :  { %v1246_v56 = vpop.permute.xlu1 %1245 }
0x1586   :  { %v1250_v57 = vmul.f32 %v1912_v3, %v1246_v56  ;;  %v1244_v58 = vpop.permute.xlu0 %1243 }
0x1587   :  { %v1249_v59 = vmul.f32 %v1910_v38, %v1244_v58 }
0x1588   :  { %1255 = vrot.lane.b32.xlu1 %v1250_v57, %s1967_s5 }
0x1589   :  { %1253 = vrot.lane.b32.xlu0 %v1249_v59, %s1967_s5 }
0x15fa   :  { %v1256_v61 = vpop.permute.xlu1 %1255 }
0x15fb   :  { %v2276_v62 = vadd.f32 %v1914_v48, %v1256_v61  ;;  %v1254_v0 = vpop.permute.xlu0 %1253 }
0x15fc   :  { %v2278_v1 = vadd.f32 %v1916_v49, %v1254_v0 }
0x15fd   :  { %v1273_v2 = vrot.slane %v2276_v62, 5 }
0x15fe   :  { %v1272_v5 = vrot.slane %v2278_v1, 6 }
0x1600   :  { %v1274_v6 = vsel %vm310_vm2, %v1273_v2, %v1272_v5 }
0x1601   :  { %1275 = vrot.lane.b32.xlu0 %v1274_v6, %s1964_s4 }
0x1673   :  { %v1276_v8 = vpop.permute.xlu0 %1275 }
0x1674   :  { %1752 = vmatmul.mubr.msk.f32.vlgmr.msra.gmra.mrb[8].mxu0 %vm158_vm3, %v1276_v8 }
0x1747   :  { %v1345_v11 = vpop.f32.mrb[8].mxu0 }
0x1748   :  { %v1368_v13 = vadd.f32 %v1345_v11, %v2079_v17  ;;  %v1753_v14 = vpop.f32.mrb[9].mxu0  ;;  %v1350_v19 = vrot.slane %v1345_v11, 1  ;;  %v1351_v21 = vrot.slane %v1345_v11, 2 }
0x174a   :  { %v1371_v15 = vrot.slane %v1368_v13, 2  ;;  %v1370_v16 = vrot.slane %v1368_v13, 1  ;;  %v1354_v22 = vadd.f32 %v1350_v19, %v2092_v32  ;;  %v1355_v23 = vadd.f32 %v1351_v21, %v2090_v29  ;;  %v1609_v13 = vld [vmem:[%s2383_s8] ss:$0 sm:$0xff]  ;;  %s1968_s8 = smov [#allocation3]  }
0x174b   :  { %s1570_s2 = sshll.u32 %s1968_s8, 4  ;;  %s1571_s2 = int_to_ptr.vmem [resolvable:$true] %s1570_s2 }
0x174c   :  { %1374 = vrot.lane.b32.xlu0 %v1371_v15, %s1964_s4  ;;  %1372 = vrot.lane.b32.xlu1 %v1370_v16, %s1964_s4  ;;  %v1607_v25 = vmul.f32 -1.442695, %v1354_v22  ;;  %v1608_v27 = vmul.f32 -1.442695, %v1355_v23  ;;  %s1937_s17 = scalar_lea.vmem %s1571_s2, 256  ;;  %p1942_p1 = scmp.lt.s32.totalorder %s1571_s2, %s1571_s2 }
0x174d   :  { %p1938_p0 = scmp.ne.s32.totalorder %s1571_s2, %s1937_s17  ;;  %p1943_p2 = scmp.lt.s32.totalorder %s1937_s17, %s1937_s17 }
0x174e   :  { %1917 = vpow2.f32 %v1607_v25 }
0x174f   :  { %1919 = vpow2.f32 %v1608_v27  ;;  %p1944_p3 = por %p1943_p2, %p1942_p1 }
0x1751   :  { %p1945_p4 = pnand %p1944_p3, %p1938_p0 }
0x1758   :  { %v1918_v28 = vpop.eup %1917 }
0x1759   :  { %v1920_v30 = vpop.eup %1919  ;;  %v1362_v17 = vadd.f32 1.0, %v1918_v28 }
0x175a   :  { %v1363_v31 = vadd.f32 1.0, %v1920_v30 }
0x175b   :  { %1921 = vrcp.f32 %v1362_v17 }
0x175c   :  { %1923 = vrcp.f32 %v1363_v31 }
0x1765   :  { %v1922_v33 = vpop.eup %1921 }
0x1766   :  { %v1924_v35 = vpop.eup %1923 }
0x17be   :  { %v1375_v37 = vpop.permute.xlu0 %1374  ;;  %v1373_v4 = vpop.permute.xlu1 %1372 }
0x17bf   :  { %v1379_v12 = vmul.f32 %v1924_v35, %v1375_v37  ;;  %v1378_v38 = vmul.f32 %v1922_v33, %v1373_v4 }
0x17c1   :  { %1384 = vrot.lane.b32.xlu0 %v1379_v12, %s1964_s4  ;;  %1382 = vrot.lane.b32.xlu1 %v1378_v38, %s1964_s4 }
0x1833   :  { %v1385_v3 = vpop.permute.xlu0 %1384  ;;  %v1383_v10 = vpop.permute.xlu1 %1382 }
0x1834   :  { %v1389_v39 = vadd.f32 %v1385_v3, %v2090_v29  ;;  %v1388_v40 = vadd.f32 %v1383_v10, %v2092_v32 }
0x1836   :  { %1925 = vtanh.f32 %v1389_v39 }
0x1837   :  { %1927 = vtanh.f32 %v1388_v40 }
0x1840   :  { %v1926_v41 = vpop.eup %1925 }
0x1841   :  { %v1928_v42 = vpop.eup %1927  ;;  %v1395_v43 = vrot.slane %v1926_v41, 1 }
0x1842   :  { %v1394_v44 = vrot.slane %v1928_v42, 1 }
0x1843   :  { %v1399_v45 = vsub.f32 %v2276_v62, %v1395_v43 }
0x1844   :  { %v1398_v48 = vsub.f32 %v2278_v1, %v1394_v44 }
0x1845   :  { %v1403_v49 = vrot.slane %v1399_v45, 7 }
0x1846   :  { %v1402_v50 = vrot.slane %v1398_v48, 7 }
0x1847   :  { %1406 = vrot.lane.b32.xlu0 %v1403_v49, %s1966_s3 }
0x1848   :  { %1404 = vrot.lane.b32.xlu1 %v1402_v50, %s1966_s3 }
0x18b9   :  { %v1407_v51 = vpop.permute.xlu0 %1406 }
0x18ba   :  { %v1411_v29 = vmul.f32 %v1924_v35, %v1407_v51  ;;  %v1405_v52 = vpop.permute.xlu1 %1404 }
0x18bb   :  { %v1410_v32 = vmul.f32 %v1922_v33, %v1405_v52 }
0x18bc   :  { %1416 = vrot.lane.b32.xlu0 %v1411_v29, %s1967_s5 }
0x18bd   :  { %1414 = vrot.lane.b32.xlu1 %v1410_v32, %s1967_s5 }
0x18c0   :  { %459 = vrot.lane.b32.xlu0 %v2134_v46, %s1964_s4 }
0x18c1   :  { %300 = vrot.lane.b32.xlu1 %v2107_v63, %s1964_s4  ;;  %v1435_v63 = vld [vmem:[%s2382_s7] sm:$0xff] }
0x18c4   :  { %780 = vrot.lane.b32.xlu0 %v2196_v26, %s1964_s4 }
0x18c5   :  { %619 = vrot.lane.b32.xlu1 %v2166_v36, %s1964_s4 }
0x18c8   :  { %1102 = vrot.lane.b32.xlu0 %v2254_v9, %s1964_s4 }
0x18c9   :  { %941 = vrot.lane.b32.xlu1 %v2225_v20, %s1964_s4 }
0x18cc   :  { %461 = vrot.lane.b32.xlu0 %v2136_v47, %s1964_s4  ;;  %v1437_v47 = vld [vmem:[%s2382_s7 + $0x10] sm:$0xff] }
0x18cd   :  { %1263 = vrot.lane.b32.xlu1 %v2278_v1, %s1964_s4 }
0x18d0   :  { %782 = vrot.lane.b32.xlu0 %v2194_v24, %s1964_s4 }
0x18d1   :  { %302 = vrot.lane.b32.xlu1 %v2104_v60, %s1964_s4  ;;  %v1436_v60 = vld [vmem:[%s2382_s7 + $0x8] sm:$0xff] }
0x18d2   :  { %v1813_v46 = vpack.c.bf16 %v1436_v60, %v1435_v63 }
0x18d4   :  { %1104 = vrot.lane.b32.xlu0 %v2252_v7, %s1964_s4  ;;  %1814 = vmatprep.subr.bf16.mxu1 %v1813_v46 }
0x18d5   :  { %621 = vrot.lane.b32.xlu1 %v2164_v34, %s1964_s4  ;;  %v1438_v34 = vld [vmem:[%s2382_s7 + $0x18] sm:$0xff]  ;;  %1816 = vmatpush3.bf16.msra.mxu1 %v1813_v46 }
0x18d6   :  { %v1817_v36 = vpack.c.bf16 %v1438_v34, %v1437_v47 }
0x18d8   :  { %1818 = vmatprep.subr.bf16.mxu1 %v1817_v36 }
0x18d9   :  { %943 = vrot.lane.b32.xlu1 %v2223_v18, %s1964_s4  ;;  %1820 = vmatpush3.bf16.msra.mxu1 %v1817_v36 }
0x18dd   :  { %1265 = vrot.lane.b32.xlu1 %v2276_v62, %s1964_s4 }
0x192e   :  { %v1417_v24 = vpop.permute.xlu0 %1416 }
0x192f   :  { %v1415_v26 = vpop.permute.xlu1 %1414  ;;  %v1421_v9 = vadd.f32 %v1926_v41, %v1417_v24 }
0x1930   :  { %v1420_v18 = vadd.f32 %v1928_v42, %v1415_v26 }
0x1932   :  { %1424 = vrot.lane.b32.xlu0 %v1420_v18, %s1964_s4  ;;  %v460_v20 = vpop.permute.xlu0 %459 }
0x1933   :  { %466 = vst.msk [vmem:[#allocation2] sm:$0x2] %vm465_vm4, %v460_v20  ;;  %v301_v7 = vpop.permute.xlu1 %300 }
0x1934   :  { %307 = vst.msk [vmem:[#allocation2] sm:$0x1] %vm306_vm5, %v301_v7 }
0x1936   :  { %1426 = vrot.lane.b32.xlu0 %v1421_v9, %s1964_s4  ;;  %v781_v53 = vpop.permute.xlu0 %780 }
0x1937   :  { %787 = vst.msk [vmem:[#allocation2] sm:$0x8] %vm786_vm6, %v781_v53  ;;  %v620_v54 = vpop.permute.xlu1 %619 }
0x1938   :  { %626 = vst.msk [vmem:[#allocation2] sm:$0x4] %vm625_vm7, %v620_v54 }
0x193a   :  { %v1103_v55 = vpop.permute.xlu0 %1102 }
0x193b   :  { %1109 = vst.msk [vmem:[#allocation2] sm:$0x20] %vm1108_vm8, %v1103_v55  ;;  %v942_v56 = vpop.permute.xlu1 %941 }
0x193c   :  { %948 = vst.msk [vmem:[#allocation2] sm:$0x10] %vm947_vm9, %v942_v56 }
0x193e   :  { %v462_v57 = vpop.permute.xlu0 %461 }
0x193f   :  { %467 = vst.msk [vmem:[#allocation2 + $0x8] sm:$0x2] %vm465_vm4, %v462_v57  ;;  %v1264_v58 = vpop.permute.xlu1 %1263 }
0x1940   :  { %1270 = vst.msk [vmem:[#allocation2] sm:$0x40] %vm1269_vm10, %v1264_v58 }
0x1942   :  { %v783_v59 = vpop.permute.xlu0 %782 }
0x1943   :  { %788 = vst.msk [vmem:[#allocation2 + $0x8] sm:$0x8] %vm786_vm6, %v783_v59  ;;  %v303_v61 = vpop.permute.xlu1 %302 }
0x1944   :  { %308 = vst.msk [vmem:[#allocation2 + $0x8] sm:$0x1] %vm306_vm5, %v303_v61 }
0x1946   :  { %v1105_v62 = vpop.permute.xlu0 %1104 }
0x1947   :  { %1110 = vst.msk [vmem:[#allocation2 + $0x8] sm:$0x20] %vm1108_vm8, %v1105_v62  ;;  %v622_v0 = vpop.permute.xlu1 %621 }
0x1948   :  { %627 = vst.msk [vmem:[#allocation2 + $0x8] sm:$0x4] %vm625_vm7, %v622_v0 }
0x194b   :  { %v944_v1 = vpop.permute.xlu1 %943 }
0x194c   :  { %949 = vst.msk [vmem:[#allocation2 + $0x8] sm:$0x10] %vm947_vm9, %v944_v1 }
0x194f   :  { %v1266_v2 = vpop.permute.xlu1 %1265 }
0x1950   :  { %1271 = vst.msk [vmem:[#allocation2 + $0x8] sm:$0x40] %vm1269_vm10, %v1266_v2 }
0x19a4   :  { %v1425_v5 = vpop.permute.xlu0 %1424 }
0x19a5   :  { %1431 = vst.msk [vmem:[#allocation2] sm:$0x80] %vm1430_vm11, %v1425_v5 }
0x19a8   :  { %v1427_v6 = vpop.permute.xlu0 %1426 }
0x19a9   :  { %1432 = vst.msk [vmem:[#allocation2 + $0x8] sm:$0x80] %vm1430_vm11, %v1427_v6 }
0x19ac   :  { %v1433_v8 = vld [vmem:[#allocation2] sm:$0xff] }
0x19ad   :  { %1762 = vmatprep.mubr.msk.f32.mxu1 %vm158_vm3, %v1433_v8 }
0x19b0   :  { %v1434_v11 = vld [vmem:[#allocation2 + $0x8] sm:$0xff] }
0x19b1   :  { %1763 = vmatmul.mubr.msk.f32.vlgmr.msra.gmra.mrb[8].mxu1 %vm158_vm3, %v1434_v11 }
0x1a84   :  { %v1764_v14 = vpop.f32.mrb[8].mxu1 }
0x1a85   :  { %v1524_v15 = vadd.f32 %v1764_v14, %v1609_v13  ;;  %v1518_v16 = vpop.f32.mrb[9].mxu1 }
0x1a86   :  { %v1519_v19 = vadd.f32 %v1609_v13, %v1518_v16 }
0x1a87   :  { %v1534_v21 = vand.u32 2147483647, %v1524_v15  ;;  %v1528_v42 = vmax.f32 %v1524_v15, 0.0  ;;  %vm1530_vm14 = vcmp.ne.f32.partialorder %v1524_v15, %v1524_v15 }
0x1a88   :  { %v1533_v22 = vand.u32 2147483647, %v1519_v19  ;;  %v1527_v48 = vmax.f32 %v1519_v19, 0.0  ;;  %vm1529_vm15 = vcmp.ne.f32.partialorder %v1519_v19, %v1519_v19 }
0x1a89   :  { %v1536_v23 = vsub.f32 0.0, %v1534_v21 }
0x1a8a   :  { %v1535_v25 = vsub.f32 0.0, %v1533_v22 }
0x1a8b   :  { %v1539_v27 = vmul.f32 1.442695, %v1536_v23 }
0x1a8c   :  { %v1537_v28 = vmul.f32 1.442695, %v1535_v25 }
0x1a8d   :  { %1929 = vpow2.f32 %v1539_v27 }
0x1a8e   :  { %1931 = vpow2.f32 %v1537_v28 }
0x1a97   :  { %v1930_v30 = vpop.eup %1929 }
0x1a98   :  { %v1932_v17 = vpop.eup %1931  ;;  %v1550_v31 = vadd.f32 1.0, %v1930_v30  ;;  %v1553_v35 = vmul.f32 -0.5, %v1930_v30  ;;  %v1556_v12 = vand.u32 2147483647, %v1930_v30 }
0x1a99   :  { %v1541_v33 = vadd.f32 1.0, %v1932_v17  ;;  %v1544_v37 = vmul.f32 -0.5, %v1932_v17  ;;  %v1547_v3 = vand.u32 2147483647, %v1932_v17 }
0x1a9a   :  { %1933 = vlog2.f32 %v1550_v31  ;;  %v1554_v4 = vadd.f32 1.0, %v1553_v35  ;;  %vm1557_vm12 = vcmp.lt.f32.partialorder %v1556_v12, 0.0004427343 }
0x1a9b   :  { %1935 = vlog2.f32 %v1541_v33  ;;  %v1545_v38 = vadd.f32 1.0, %v1544_v37  ;;  %vm1548_vm13 = vcmp.lt.f32.partialorder %v1547_v3, 0.0004427343 }
0x1a9c   :  { %v1555_v41 = vmul.f32 %v1930_v30, %v1554_v4 }
0x1a9d   :  { %v1546_v44 = vmul.f32 %v1932_v17, %v1545_v38 }
0x1aa4   :  { %v1934_v10 = vpop.eup %1933 }
0x1aa5   :  { %v1936_v39 = vpop.eup %1935  ;;  %v1552_v40 = vmul.f32 0.6931472, %v1934_v10 }
0x1aa6   :  { %v1543_v43 = vmul.f32 0.6931472, %v1936_v39 }
0x1aa7   :  { %v1558_v45 = vsel %vm1557_vm12, %v1555_v41, %v1552_v40 }
0x1aa8   :  { %v1560_v49 = vadd.f32 %v1558_v45, %v1528_v42  ;;  %v1549_v50 = vsel %vm1548_vm13, %v1546_v44, %v1543_v43 }
0x1aa9   :  { %v1559_v51 = vadd.f32 %v1549_v50, %v1527_v48 }
0x1aaa   :  { %v1562_v29 = vsel %vm1530_vm14, %v1524_v15, %v1560_v49 }
0x1aab   :  { %1564 = vst.msk [vmem:[#allocation3 + $0x8] sm:$0xff] %vm57_vm0, %v1562_v29  ;;  %v1561_v52 = vsel %vm1529_vm15, %v1519_v19, %v1559_v51 }
0x1aac   :  { %1563 = vst.msk [vmem:[#allocation3] sm:$0xff] %vm57_vm0, %v1561_v52 }
0x1aad   :  { %1948 = shalt.err (!%p1945_p4)
}
0x1aae   :  { %s1949_s20 = scalar_lea.hbm %s2384_s9, 256 }
0x1aaf   :  { %p1950_p5 = scmp.ne.s32.totalorder %s2384_s9, %s1949_s20  ;;  %p1953_p6 = scmp.lt.u32.totalorder %s1949_s20, %s2384_s9 }
0x1ab1   :  { %p1955_p7 = pnand %p1953_p6, %p1950_p5 }
0x1ab3   :  { %1958 = shalt.err (!%p1955_p7)
}
0x1ab4   :  { %s1969_s24 = smov 128   ;;  %s1970_s4 = smov 8  }
0x1ab5   :  { %1576 = dma.vmem_to_hbm [thread:$0]  %s1571_s2, 256, %s2384_s9, [#allocation4], %s1969_s24, %s1969_s24, %s1970_s4  }
0x1ab6   :  { %1959 = dma.done.wait [#allocation4], 256  }
0x1ab7   :  { %1960 = vsyncadd [#allocation4], 4294967040 }
0x1ab8   :  { %1580 = vsyncpa [#allocation4], 1 }

</bundles_post_ra>
